<compile_context>
chip_gen: v7x
topology: tpu7x:2x2x1
jax: 0.10.0
libtpu: 0.0.40
codegen_flags: <defaults>
</compile_context>

<pallas_src>
import functools

import jax
import jax.numpy as jnp
from jax import lax
from jax.experimental import pallas as pl
from jax.experimental.pallas import tpu as pltpu


def _lstm2_kernel(x_ref, usex_ref, featg_ref, wu_ref, wx_ref, wh_ref, b_ref,
                  wffn_ref, bffn_ref, out_ref, *, seq_len, num_layers,
                  hidden_dim):
    H = hidden_dim
    L = num_layers

    # hoisted constants (JAX does not CSE broadcast_in_dim inside loops)
    sig_mask = lax.broadcasted_iota(jnp.int32, (1, 4 * H), 1) < 3 * H  # i,f,o lanes
    out_lane = lax.broadcasted_iota(jnp.int32, (1, seq_len), 1)        # (1, S)
    wffn = wffn_ref[...]                                               # (1, H)
    b_ffn = bffn_ref[0]                                                # scalar (SMEM)
    wu = wu_ref[...]                                                   # (1, 4H) prescaled
    # loop-invariant weights, loaded once (small; few vregs pinned)
    whs = [wh_ref[l] for l in range(L)]                                # (H, 4H)
    wxs = [None] + [wx_ref[l] for l in range(1, L)]                    # (H, 4H), l>=1
    bs = [None] + [b_ref[l] for l in range(1, L)]                      # (1, 4H), l>=1

    def step(t, carry):
        hs, cs, y_prev, ys = carry
        # teacher-forcing select on scalars (SMEM reads, no vector DMA)
        u = jnp.where(usex_ref[t] != 0, x_ref[t], y_prev)              # f32 scalar
        fg = featg_ref[pl.ds(t, 1), :]                                 # (1, 4H): feat@W + b0

        new_hs, new_cs = [], []
        x_l = None
        for l in range(L):
            if l == 0:
                gates = (fg + u * wu
                         + jnp.dot(hs[0], whs[0],
                                   preferred_element_type=jnp.float32))
            else:
                gates = (jnp.dot(x_l, wxs[l],
                                 preferred_element_type=jnp.float32)
                         + jnp.dot(hs[l], whs[l],
                                   preferred_element_type=jnp.float32)
                         + bs[l])
            # single-tanh activation: i/f/o weights were pre-scaled by 0.5, so
            # sigmoid(g) == 0.5*tanh(g/2) + 0.5; g-block left unscaled -> tanh.
            t_act = jnp.tanh(gates)                                    # 1 EUP push
            act = jnp.where(sig_mask, 0.5 * t_act + 0.5, t_act)
            i_g = act[:, 0:H]
            f_g = act[:, H:2 * H]
            o_g = act[:, 2 * H:3 * H]
            g_g = act[:, 3 * H:4 * H]
            c_new = f_g * cs[l] + i_g * g_g
            h_new = o_g * jnp.tanh(c_new)
            new_hs.append(h_new)
            new_cs.append(c_new)
            x_l = h_new                                                # feeds next layer

        # ffn: hidden_dim -> 1 (scalar)
        y = jnp.sum(x_l * wffn) + b_ffn
        ys = jnp.where(out_lane == t, y, ys)                           # lane-dense accumulate
        return (tuple(new_hs), tuple(new_cs), y, ys)

    init = (tuple(jnp.zeros((1, H), jnp.float32) for _ in range(L)),
            tuple(jnp.zeros((1, H), jnp.float32) for _ in range(L)),
            jnp.float32(0.0),
            jnp.zeros((1, seq_len), jnp.float32))
    _, _, _, ys = lax.fori_loop(0, seq_len, step, init, unroll=True)
    out_ref[...] = ys                                                  # single dense store


def make_params(key, input_dim, hidden_dim, num_layers):
    """Deterministic LSTM/Linear parameters in PyTorch layout."""
    H = hidden_dim
    k = 1.0 / (H ** 0.5)
    keys = jax.random.split(key, num_layers * 4 + 2)
    ki = 0
    lstm = []
    for l in range(num_layers):
        in_l = input_dim if l == 0 else H
        w_ih = jax.random.uniform(keys[ki], (4 * H, in_l), jnp.float32, -k, k); ki += 1
        w_hh = jax.random.uniform(keys[ki], (4 * H, H), jnp.float32, -k, k); ki += 1
        b_ih = jax.random.uniform(keys[ki], (4 * H,), jnp.float32, -k, k); ki += 1
        b_hh = jax.random.uniform(keys[ki], (4 * H,), jnp.float32, -k, k); ki += 1
        lstm.append((w_ih, w_hh, b_ih, b_hh))
    w_ffn = jax.random.uniform(keys[ki], (1, H), jnp.float32, -k, k); ki += 1
    b_ffn = jax.random.uniform(keys[ki], (1,), jnp.float32, -k, k); ki += 1
    return {"lstm": lstm, "ffn": (w_ffn, b_ffn)}


def teacher_force_decisions(mask, teacher_force_ratio, key):
    # TODO(synk): np.random.rand draws are reproduced with jax.random (same
    # semantics -- Bernoulli(teacher_force_ratio) -- not bitwise identical).
    seq_len = mask.shape[0]
    rand = jax.random.uniform(key, (seq_len,))
    idx = jnp.arange(seq_len)
    return jnp.where(idx == 0, True,
                     jnp.where(mask == 0, False, rand < teacher_force_ratio))


def lstm2_forward_pallas(x, use_x, features, params, hidden_dim, num_layers):
    seq_len = x.shape[0]
    H, L = hidden_dim, num_layers
    G = 4 * H

    def reorder_prescale(w):
        """PyTorch gate blocks (i, f, g, o) -> (i, f, o, g); i/f/o pre-scaled
        by 0.5 so the kernel can use a single tanh (sigmoid(x)=0.5*tanh(x/2)+0.5).
        The g block is NOT scaled."""
        return jnp.concatenate(
            [0.5 * w[:2 * H], 0.5 * w[3 * H:4 * H], w[2 * H:3 * H]], axis=0)

    x1 = x.astype(jnp.float32)                       # (S,)   -> SMEM
    usex1 = use_x.astype(jnp.int32)                  # (S,)   -> SMEM
    feats = features.astype(jnp.float32)             # (S, F)

    lstm = params["lstm"]
    # layer 0: split into u-column, feature block (precomputed), recurrent block
    w_ih0, w_hh0, b_ih0, b_hh0 = lstm[0]
    w_ih0_rp = reorder_prescale(w_ih0.astype(jnp.float32))            # (4H, 1+F)
    b0_rp = reorder_prescale((b_ih0 + b_hh0).astype(jnp.float32))     # (4H,)
    w_u0 = w_ih0_rp[:, 0].reshape(1, G)                               # (1, 4H)
    feat_gates = feats @ w_ih0_rp[:, 1:].T + b0_rp[None, :]           # (S, 4H) incl. bias

    # per-layer recurrent / input weights (transposed to (H, 4H)), gate order i,f,o,g
    w_hh_all = jnp.zeros((L, H, G), jnp.float32)
    w_x_all = jnp.zeros((L, H, G), jnp.float32)      # layer-0 slice unused
    b_all = jnp.zeros((L, 1, G), jnp.float32)        # layer-0 slice unused (folded above)
    for l in range(L):
        w_ih, w_hh, b_ih, b_hh = lstm[l]
        w_hh_all = w_hh_all.at[l].set(reorder_prescale(w_hh.astype(jnp.float32)).T)
        if l > 0:
            w_x_all = w_x_all.at[l].set(reorder_prescale(w_ih.astype(jnp.float32)).T)
            b_all = b_all.at[l, 0].set(
                reorder_prescale((b_ih + b_hh).astype(jnp.float32)))

    w_ffn, b_ffn = params["ffn"]
    w_ffn2 = w_ffn.reshape(1, H).astype(jnp.float32)
    b_ffn1 = b_ffn.reshape(1).astype(jnp.float32)    # (1,)  -> SMEM

    kernel = functools.partial(_lstm2_kernel, seq_len=seq_len,
                               num_layers=L, hidden_dim=H)

    out = pl.pallas_call(
        kernel,
        out_shape=jax.ShapeDtypeStruct((1, seq_len), jnp.float32),
        in_specs=[
            pl.BlockSpec(memory_space=pltpu.MemorySpace.SMEM),   # x
            pl.BlockSpec(memory_space=pltpu.MemorySpace.SMEM),   # use_x
            pl.BlockSpec(memory_space=pltpu.MemorySpace.VMEM),   # feat_gates (layer-0)
            pl.BlockSpec(memory_space=pltpu.MemorySpace.VMEM),   # w_u0
            pl.BlockSpec(memory_space=pltpu.MemorySpace.VMEM),   # w_x_all (layers >= 1)
            pl.BlockSpec(memory_space=pltpu.MemorySpace.VMEM),   # w_hh_all
            pl.BlockSpec(memory_space=pltpu.MemorySpace.VMEM),   # b_all (layers >= 1)
            pl.BlockSpec(memory_space=pltpu.MemorySpace.VMEM),   # ffn weight
            pl.BlockSpec(memory_space=pltpu.MemorySpace.SMEM),   # ffn bias
        ],
        out_specs=pl.BlockSpec(memory_space=pltpu.MemorySpace.VMEM),
    )(x1, usex1, feat_gates, w_u0, w_x_all, w_hh_all, b_all, w_ffn2, b_ffn1)
    return out.reshape(-1)


def lstm2_forward_ref(x, use_x, features, params, hidden_dim, num_layers):
    """Pure-JAX reference matching the PyTorch forward semantics."""
    seq_len = x.shape[0]
    H = hidden_dim
    h = [jnp.zeros((H,), jnp.float32) for _ in range(num_layers)]
    c = [jnp.zeros((H,), jnp.float32) for _ in range(num_layers)]
    y_prev = jnp.float32(0.0)
    outs = []
    for t in range(seq_len):
        u = jnp.where(use_x[t], x[t], y_prev).astype(jnp.float32)
        xl = jnp.concatenate([u[None], features[t].astype(jnp.float32)])
        for l, (w_ih, w_hh, b_ih, b_hh) in enumerate(params["lstm"]):
            g = w_ih @ xl + w_hh @ h[l] + b_ih + b_hh
            i_g = jax.nn.sigmoid(g[:H])
            f_g = jax.nn.sigmoid(g[H:2 * H])
            g_g = jnp.tanh(g[2 * H:3 * H])
            o_g = jax.nn.sigmoid(g[3 * H:])
            c[l] = f_g * c[l] + i_g * g_g
            h[l] = o_g * jnp.tanh(c[l])
            xl = h[l]
        w_ffn, b_ffn = params["ffn"]
        y = (w_ffn @ xl + b_ffn)[0]
        y_prev = y
        outs.append(y)
    return jnp.stack(outs)


if __name__ == "__main__":
    seq_len, num_feat, hidden_dim, num_layers = 8, 3, 32, 2
    input_dim = 1 + num_feat
    teacher_force_ratio = 0.5

    key = jax.random.PRNGKey(0)
    kx, kf, kp, kt = jax.random.split(key, 4)
    x = jax.random.normal(kx, (seq_len,), jnp.float32)
    features = jax.random.normal(kf, (seq_len, num_feat), jnp.float32)
    mask = jnp.array([1, 1, 0, 1, 1, 0, 1, 1], jnp.int32)

    params = make_params(kp, input_dim, hidden_dim, num_layers)
    use_x = teacher_force_decisions(mask, teacher_force_ratio, kt)

    y = lstm2_forward_pallas(x, use_x, features, params, hidden_dim, num_layers)
    y = jax.block_until_ready(y)

    y_ref = lstm2_forward_ref(x, use_x, features, params, hidden_dim, num_layers)
    assert y.shape == (seq_len,)
    assert jnp.allclose(y, y_ref, atol=1e-2, rtol=1e-2), (y, y_ref)
    print("KERNEL_OK")
</pallas_src>

<mosaic_0001>
module attributes {stable_mosaic.version = 11 : i64} {
  func.func @_lstm2_kernel(%arg0: memref<8xf32, #tpu.memory_space<smem>>, %arg1: memref<8xi32, #tpu.memory_space<smem>>, %arg2: memref<8x128xf32, #tpu.memory_space<vmem>>, %arg3: memref<1x128xf32, #tpu.memory_space<vmem>>, %arg4: memref<2x32x128xf32, #tpu.memory_space<vmem>>, %arg5: memref<2x32x128xf32, #tpu.memory_space<vmem>>, %arg6: memref<2x1x128xf32, #tpu.memory_space<vmem>>, %arg7: memref<1x32xf32, #tpu.memory_space<vmem>>, %arg8: memref<1xf32, #tpu.memory_space<smem>>, %arg9: memref<1x8xf32, #tpu.memory_space<vmem>>) attributes {dimension_semantics = [], scalar_prefetch = 0 : i64, scratch_operands = 0 : i64, tpu.core_type = #tpu.core_type<tc>} {
    %0 = tpu.iota {dimensions = array<i32: 1>} : vector<1x128xi32>
    %c96_i32 = arith.constant 96 : i32
    %1 = vector.broadcast %c96_i32 : i32 to vector<1x128xi32>
    %2 = arith.cmpi slt, %0, %1 : vector<1x128xi32>
    %3 = tpu.iota {dimensions = array<i32: 1>} : vector<1x8xi32>
    %c0 = arith.constant 0 : index
    %c0_0 = arith.constant 0 : index
    %4 = vector.load %arg7[%c0, %c0_0] : memref<1x32xf32, #tpu.memory_space<vmem>>, vector<1x32xf32>
    %c0_1 = arith.constant 0 : index
    %5 = memref.load %arg8[%c0_1] : memref<1xf32, #tpu.memory_space<smem>>
    %c0_2 = arith.constant 0 : index
    %c0_3 = arith.constant 0 : index
    %6 = vector.load %arg3[%c0_2, %c0_3] : memref<1x128xf32, #tpu.memory_space<vmem>>, vector<1x128xf32>
    %c0_4 = arith.constant 0 : index
    %c0_5 = arith.constant 0 : index
    %c0_6 = arith.constant 0 : index
    %7 = vector.load %arg5[%c0_4, %c0_5, %c0_6] : memref<2x32x128xf32, #tpu.memory_space<vmem>>, vector<1x32x128xf32>
    %8 = vector.shape_cast %7 : vector<1x32x128xf32> to vector<32x128xf32>
    %c1 = arith.constant 1 : index
    %c0_7 = arith.constant 0 : index
    %c0_8 = arith.constant 0 : index
    %9 = vector.load %arg5[%c1, %c0_7, %c0_8] : memref<2x32x128xf32, #tpu.memory_space<vmem>>, vector<1x32x128xf32>
    %10 = vector.shape_cast %9 : vector<1x32x128xf32> to vector<32x128xf32>
    %c1_9 = arith.constant 1 : index
    %c0_10 = arith.constant 0 : index
    %c0_11 = arith.constant 0 : index
    %11 = vector.load %arg4[%c1_9, %c0_10, %c0_11] : memref<2x32x128xf32, #tpu.memory_space<vmem>>, vector<1x32x128xf32>
    %12 = vector.shape_cast %11 : vector<1x32x128xf32> to vector<32x128xf32>
    %c1_12 = arith.constant 1 : index
    %c0_13 = arith.constant 0 : index
    %c0_14 = arith.constant 0 : index
    %13 = vector.load %arg6[%c1_12, %c0_13, %c0_14] : memref<2x1x128xf32, #tpu.memory_space<vmem>>, vector<1x1x128xf32>
    %14 = vector.shape_cast %13 : vector<1x1x128xf32> to vector<1x128xf32>
    %cst = arith.constant 0.000000e+00 : f32
    %15 = vector.broadcast %cst : f32 to vector<1x32xf32>
    %cst_15 = arith.constant 0.000000e+00 : f32
    %16 = vector.broadcast %cst_15 : f32 to vector<1x32xf32>
    %cst_16 = arith.constant 0.000000e+00 : f32
    %17 = vector.broadcast %cst_16 : f32 to vector<1x32xf32>
    %cst_17 = arith.constant 0.000000e+00 : f32
    %18 = vector.broadcast %cst_17 : f32 to vector<1x32xf32>
    %cst_18 = arith.constant 0.000000e+00 : f32
    %19 = vector.broadcast %cst_18 : f32 to vector<1x8xf32>
    %cst_19 = arith.constant 0.000000e+00 : f32
    %c0_i32 = arith.constant 0 : i32
    %20 = arith.index_cast %c0_i32 : i32 to index
    %21 = memref.load %arg1[%20] : memref<8xi32, #tpu.memory_space<smem>>
    %c0_i32_20 = arith.constant 0 : i32
    %22 = arith.cmpi ne, %21, %c0_i32_20 : i32
    %23 = arith.index_cast %c0_i32 : i32 to index
    %24 = memref.load %arg0[%23] : memref<8xf32, #tpu.memory_space<smem>>
    %25 = arith.select %22, %24, %cst_19 : f32
    %26 = arith.index_cast %c0_i32 : i32 to index
    %c0_21 = arith.constant 0 : index
    %27 = vector.load %arg2[%26, %c0_21] : memref<8x128xf32, #tpu.memory_space<vmem>>, vector<1x128xf32>
    %28 = vector.broadcast %25 : f32 to vector<1x128xf32>
    %29 = arith.mulf %28, %6 : vector<1x128xf32>
    %30 = arith.addf %27, %29 : vector<1x128xf32>
    %cst_22 = arith.constant dense<0.000000e+00> : vector<1x128xf32>
    %31 = tpu.matmul %15, %8, %cst_22 {dimension_numbers = #tpu.dot_dimension_numbers<[1], [0], [0], [1], [0, 0, 1, 1], [], []>} : vector<1x32xf32>, vector<32x128xf32>, vector<1x128xf32> -> vector<1x128xf32>
    %32 = arith.addf %30, %31 : vector<1x128xf32>
    %33 = math.tanh %32 : vector<1x128xf32>
    %cst_23 = arith.constant 5.000000e-01 : f32
    %34 = vector.broadcast %cst_23 : f32 to vector<1x128xf32>
    %35 = arith.mulf %34, %33 : vector<1x128xf32>
    %cst_24 = arith.constant 5.000000e-01 : f32
    %36 = vector.broadcast %cst_24 : f32 to vector<1x128xf32>
    %37 = arith.addf %35, %36 : vector<1x128xf32>
    %38 = arith.select %2, %37, %33 : vector<1x128xi1>, vector<1x128xf32>
    %39 = vector.extract_strided_slice %38 {offsets = [0, 0], sizes = [1, 32], strides = [1, 1]} : vector<1x128xf32> to vector<1x32xf32>
    %40 = vector.extract_strided_slice %38 {offsets = [0, 32], sizes = [1, 32], strides = [1, 1]} : vector<1x128xf32> to vector<1x32xf32>
    %41 = vector.extract_strided_slice %38 {offsets = [0, 64], sizes = [1, 32], strides = [1, 1]} : vector<1x128xf32> to vector<1x32xf32>
    %42 = vector.extract_strided_slice %38 {offsets = [0, 96], sizes = [1, 32], strides = [1, 1]} : vector<1x128xf32> to vector<1x32xf32>
    %43 = arith.mulf %40, %17 : vector<1x32xf32>
    %44 = arith.mulf %39, %42 : vector<1x32xf32>
    %45 = arith.addf %43, %44 : vector<1x32xf32>
    %46 = math.tanh %45 : vector<1x32xf32>
    %47 = arith.mulf %41, %46 : vector<1x32xf32>
    %cst_25 = arith.constant dense<0.000000e+00> : vector<1x128xf32>
    %48 = tpu.matmul %47, %12, %cst_25 {dimension_numbers = #tpu.dot_dimension_numbers<[1], [0], [0], [1], [0, 0, 1, 1], [], []>} : vector<1x32xf32>, vector<32x128xf32>, vector<1x128xf32> -> vector<1x128xf32>
    %cst_26 = arith.constant dense<0.000000e+00> : vector<1x128xf32>
    %49 = tpu.matmul %16, %10, %cst_26 {dimension_numbers = #tpu.dot_dimension_numbers<[1], [0], [0], [1], [0, 0, 1, 1], [], []>} : vector<1x32xf32>, vector<32x128xf32>, vector<1x128xf32> -> vector<1x128xf32>
    %50 = arith.addf %48, %49 : vector<1x128xf32>
    %51 = arith.addf %50, %14 : vector<1x128xf32>
    %52 = math.tanh %51 : vector<1x128xf32>
    %cst_27 = arith.constant 5.000000e-01 : f32
    %53 = vector.broadcast %cst_27 : f32 to vector<1x128xf32>
    %54 = arith.mulf %53, %52 : vector<1x128xf32>
    %cst_28 = arith.constant 5.000000e-01 : f32
    %55 = vector.broadcast %cst_28 : f32 to vector<1x128xf32>
    %56 = arith.addf %54, %55 : vector<1x128xf32>
    %57 = arith.select %2, %56, %52 : vector<1x128xi1>, vector<1x128xf32>
    %58 = vector.extract_strided_slice %57 {offsets = [0, 0], sizes = [1, 32], strides = [1, 1]} : vector<1x128xf32> to vector<1x32xf32>
    %59 = vector.extract_strided_slice %57 {offsets = [0, 32], sizes = [1, 32], strides = [1, 1]} : vector<1x128xf32> to vector<1x32xf32>
    %60 = vector.extract_strided_slice %57 {offsets = [0, 64], sizes = [1, 32], strides = [1, 1]} : vector<1x128xf32> to vector<1x32xf32>
    %61 = vector.extract_strided_slice %57 {offsets = [0, 96], sizes = [1, 32], strides = [1, 1]} : vector<1x128xf32> to vector<1x32xf32>
    %62 = arith.mulf %59, %18 : vector<1x32xf32>
    %63 = arith.mulf %58, %61 : vector<1x32xf32>
    %64 = arith.addf %62, %63 : vector<1x32xf32>
    %65 = math.tanh %64 : vector<1x32xf32>
    %66 = arith.mulf %60, %65 : vector<1x32xf32>
    %67 = arith.mulf %66, %4 : vector<1x32xf32>
    %68 = vector.shape_cast %67 : vector<1x32xf32> to vector<1x1x32xf32>
    %cst_29 = arith.constant dense<0.000000e+00> : vector<1xf32>
    %69 = vector.multi_reduction <add>, %68, %cst_29 [1, 2] : vector<1x1x32xf32> to vector<1xf32>
    %70 = vector.shape_cast %69 : vector<1xf32> to vector<1x1x1xf32>
    %71 = vector.extract %70[0, 0, 0] : f32 from vector<1x1x1xf32>
    %72 = arith.addf %71, %5 : f32
    %73 = vector.broadcast %c0_i32 : i32 to vector<1x8xi32>
    %74 = arith.cmpi eq, %3, %73 : vector<1x8xi32>
    %75 = vector.broadcast %72 : f32 to vector<1x8xf32>
    %76 = arith.select %74, %75, %19 : vector<1x8xi1>, vector<1x8xf32>
    %c1_i32 = arith.constant 1 : i32
    %77 = arith.index_cast %c1_i32 : i32 to index
    %78 = memref.load %arg1[%77] : memref<8xi32, #tpu.memory_space<smem>>
    %c0_i32_30 = arith.constant 0 : i32
    %79 = arith.cmpi ne, %78, %c0_i32_30 : i32
    %80 = arith.index_cast %c1_i32 : i32 to index
    %81 = memref.load %arg0[%80] : memref<8xf32, #tpu.memory_space<smem>>
    %82 = arith.select %79, %81, %72 : f32
    %83 = arith.index_cast %c1_i32 : i32 to index
    %c0_31 = arith.constant 0 : index
    %84 = vector.load %arg2[%83, %c0_31] : memref<8x128xf32, #tpu.memory_space<vmem>>, vector<1x128xf32>
    %85 = vector.broadcast %82 : f32 to vector<1x128xf32>
    %86 = arith.mulf %85, %6 : vector<1x128xf32>
    %87 = arith.addf %84, %86 : vector<1x128xf32>
    %cst_32 = arith.constant dense<0.000000e+00> : vector<1x128xf32>
    %88 = tpu.matmul %47, %8, %cst_32 {dimension_numbers = #tpu.dot_dimension_numbers<[1], [0], [0], [1], [0, 0, 1, 1], [], []>} : vector<1x32xf32>, vector<32x128xf32>, vector<1x128xf32> -> vector<1x128xf32>
    %89 = arith.addf %87, %88 : vector<1x128xf32>
    %90 = math.tanh %89 : vector<1x128xf32>
    %cst_33 = arith.constant 5.000000e-01 : f32
    %91 = vector.broadcast %cst_33 : f32 to vector<1x128xf32>
    %92 = arith.mulf %91, %90 : vector<1x128xf32>
    %cst_34 = arith.constant 5.000000e-01 : f32
    %93 = vector.broadcast %cst_34 : f32 to vector<1x128xf32>
    %94 = arith.addf %92, %93 : vector<1x128xf32>
    %95 = arith.select %2, %94, %90 : vector<1x128xi1>, vector<1x128xf32>
    %96 = vector.extract_strided_slice %95 {offsets = [0, 0], sizes = [1, 32], strides = [1, 1]} : vector<1x128xf32> to vector<1x32xf32>
    %97 = vector.extract_strided_slice %95 {offsets = [0, 32], sizes = [1, 32], strides = [1, 1]} : vector<1x128xf32> to vector<1x32xf32>
    %98 = vector.extract_strided_slice %95 {offsets = [0, 64], sizes = [1, 32], strides = [1, 1]} : vector<1x128xf32> to vector<1x32xf32>
    %99 = vector.extract_strided_slice %95 {offsets = [0, 96], sizes = [1, 32], strides = [1, 1]} : vector<1x128xf32> to vector<1x32xf32>
    %100 = arith.mulf %97, %45 : vector<1x32xf32>
    %101 = arith.mulf %96, %99 : vector<1x32xf32>
    %102 = arith.addf %100, %101 : vector<1x32xf32>
    %103 = math.tanh %102 : vector<1x32xf32>
    %104 = arith.mulf %98, %103 : vector<1x32xf32>
    %cst_35 = arith.constant dense<0.000000e+00> : vector<1x128xf32>
    %105 = tpu.matmul %104, %12, %cst_35 {dimension_numbers = #tpu.dot_dimension_numbers<[1], [0], [0], [1], [0, 0, 1, 1], [], []>} : vector<1x32xf32>, vector<32x128xf32>, vector<1x128xf32> -> vector<1x128xf32>
    %cst_36 = arith.constant dense<0.000000e+00> : vector<1x128xf32>
    %106 = tpu.matmul %66, %10, %cst_36 {dimension_numbers = #tpu.dot_dimension_numbers<[1], [0], [0], [1], [0, 0, 1, 1], [], []>} : vector<1x32xf32>, vector<32x128xf32>, vector<1x128xf32> -> vector<1x128xf32>
    %107 = arith.addf %105, %106 : vector<1x128xf32>
    %108 = arith.addf %107, %14 : vector<1x128xf32>
    %109 = math.tanh %108 : vector<1x128xf32>
    %cst_37 = arith.constant 5.000000e-01 : f32
    %110 = vector.broadcast %cst_37 : f32 to vector<1x128xf32>
    %111 = arith.mulf %110, %109 : vector<1x128xf32>
    %cst_38 = arith.constant 5.000000e-01 : f32
    %112 = vector.broadcast %cst_38 : f32 to vector<1x128xf32>
    %113 = arith.addf %111, %112 : vector<1x128xf32>
    %114 = arith.select %2, %113, %109 : vector<1x128xi1>, vector<1x128xf32>
    %115 = vector.extract_strided_slice %114 {offsets = [0, 0], sizes = [1, 32], strides = [1, 1]} : vector<1x128xf32> to vector<1x32xf32>
    %116 = vector.extract_strided_slice %114 {offsets = [0, 32], sizes = [1, 32], strides = [1, 1]} : vector<1x128xf32> to vector<1x32xf32>
    %117 = vector.extract_strided_slice %114 {offsets = [0, 64], sizes = [1, 32], strides = [1, 1]} : vector<1x128xf32> to vector<1x32xf32>
    %118 = vector.extract_strided_slice %114 {offsets = [0, 96], sizes = [1, 32], strides = [1, 1]} : vector<1x128xf32> to vector<1x32xf32>
    %119 = arith.mulf %116, %64 : vector<1x32xf32>
    %120 = arith.mulf %115, %118 : vector<1x32xf32>
    %121 = arith.addf %119, %120 : vector<1x32xf32>
    %122 = math.tanh %121 : vector<1x32xf32>
    %123 = arith.mulf %117, %122 : vector<1x32xf32>
    %124 = arith.mulf %123, %4 : vector<1x32xf32>
    %125 = vector.shape_cast %124 : vector<1x32xf32> to vector<1x1x32xf32>
    %cst_39 = arith.constant dense<0.000000e+00> : vector<1xf32>
    %126 = vector.multi_reduction <add>, %125, %cst_39 [1, 2] : vector<1x1x32xf32> to vector<1xf32>
    %127 = vector.shape_cast %126 : vector<1xf32> to vector<1x1x1xf32>
    %128 = vector.extract %127[0, 0, 0] : f32 from vector<1x1x1xf32>
    %129 = arith.addf %128, %5 : f32
    %130 = vector.broadcast %c1_i32 : i32 to vector<1x8xi32>
    %131 = arith.cmpi eq, %3, %130 : vector<1x8xi32>
    %132 = vector.broadcast %129 : f32 to vector<1x8xf32>
    %133 = arith.select %131, %132, %76 : vector<1x8xi1>, vector<1x8xf32>
    %c2_i32 = arith.constant 2 : i32
    %134 = arith.index_cast %c2_i32 : i32 to index
    %135 = memref.load %arg1[%134] : memref<8xi32, #tpu.memory_space<smem>>
    %c0_i32_40 = arith.constant 0 : i32
    %136 = arith.cmpi ne, %135, %c0_i32_40 : i32
    %137 = arith.index_cast %c2_i32 : i32 to index
    %138 = memref.load %arg0[%137] : memref<8xf32, #tpu.memory_space<smem>>
    %139 = arith.select %136, %138, %129 : f32
    %140 = arith.index_cast %c2_i32 : i32 to index
    %c0_41 = arith.constant 0 : index
    %141 = vector.load %arg2[%140, %c0_41] : memref<8x128xf32, #tpu.memory_space<vmem>>, vector<1x128xf32>
    %142 = vector.broadcast %139 : f32 to vector<1x128xf32>
    %143 = arith.mulf %142, %6 : vector<1x128xf32>
    %144 = arith.addf %141, %143 : vector<1x128xf32>
    %cst_42 = arith.constant dense<0.000000e+00> : vector<1x128xf32>
    %145 = tpu.matmul %104, %8, %cst_42 {dimension_numbers = #tpu.dot_dimension_numbers<[1], [0], [0], [1], [0, 0, 1, 1], [], []>} : vector<1x32xf32>, vector<32x128xf32>, vector<1x128xf32> -> vector<1x128xf32>
    %146 = arith.addf %144, %145 : vector<1x128xf32>
    %147 = math.tanh %146 : vector<1x128xf32>
    %cst_43 = arith.constant 5.000000e-01 : f32
    %148 = vector.broadcast %cst_43 : f32 to vector<1x128xf32>
    %149 = arith.mulf %148, %147 : vector<1x128xf32>
    %cst_44 = arith.constant 5.000000e-01 : f32
    %150 = vector.broadcast %cst_44 : f32 to vector<1x128xf32>
    %151 = arith.addf %149, %150 : vector<1x128xf32>
    %152 = arith.select %2, %151, %147 : vector<1x128xi1>, vector<1x128xf32>
    %153 = vector.extract_strided_slice %152 {offsets = [0, 0], sizes = [1, 32], strides = [1, 1]} : vector<1x128xf32> to vector<1x32xf32>
    %154 = vector.extract_strided_slice %152 {offsets = [0, 32], sizes = [1, 32], strides = [1, 1]} : vector<1x128xf32> to vector<1x32xf32>
    %155 = vector.extract_strided_slice %152 {offsets = [0, 64], sizes = [1, 32], strides = [1, 1]} : vector<1x128xf32> to vector<1x32xf32>
    %156 = vector.extract_strided_slice %152 {offsets = [0, 96], sizes = [1, 32], strides = [1, 1]} : vector<1x128xf32> to vector<1x32xf32>
    %157 = arith.mulf %154, %102 : vector<1x32xf32>
    %158 = arith.mulf %153, %156 : vector<1x32xf32>
    %159 = arith.addf %157, %158 : vector<1x32xf32>
    %160 = math.tanh %159 : vector<1x32xf32>
    %161 = arith.mulf %155, %160 : vector<1x32xf32>
    %cst_45 = arith.constant dense<0.000000e+00> : vector<1x128xf32>
    %162 = tpu.matmul %161, %12, %cst_45 {dimension_numbers = #tpu.dot_dimension_numbers<[1], [0], [0], [1], [0, 0, 1, 1], [], []>} : vector<1x32xf32>, vector<32x128xf32>, vector<1x128xf32> -> vector<1x128xf32>
    %cst_46 = arith.constant dense<0.000000e+00> : vector<1x128xf32>
    %163 = tpu.matmul %123, %10, %cst_46 {dimension_numbers = #tpu.dot_dimension_numbers<[1], [0], [0], [1], [0, 0, 1, 1], [], []>} : vector<1x32xf32>, vector<32x128xf32>, vector<1x128xf32> -> vector<1x128xf32>
    %164 = arith.addf %162, %163 : vector<1x128xf32>
    %165 = arith.addf %164, %14 : vector<1x128xf32>
    %166 = math.tanh %165 : vector<1x128xf32>
    %cst_47 = arith.constant 5.000000e-01 : f32
    %167 = vector.broadcast %cst_47 : f32 to vector<1x128xf32>
    %168 = arith.mulf %167, %166 : vector<1x128xf32>
    %cst_48 = arith.constant 5.000000e-01 : f32
    %169 = vector.broadcast %cst_48 : f32 to vector<1x128xf32>
    %170 = arith.addf %168, %169 : vector<1x128xf32>
    %171 = arith.select %2, %170, %166 : vector<1x128xi1>, vector<1x128xf32>
    %172 = vector.extract_strided_slice %171 {offsets = [0, 0], sizes = [1, 32], strides = [1, 1]} : vector<1x128xf32> to vector<1x32xf32>
    %173 = vector.extract_strided_slice %171 {offsets = [0, 32], sizes = [1, 32], strides = [1, 1]} : vector<1x128xf32> to vector<1x32xf32>
    %174 = vector.extract_strided_slice %171 {offsets = [0, 64], sizes = [1, 32], strides = [1, 1]} : vector<1x128xf32> to vector<1x32xf32>
    %175 = vector.extract_strided_slice %171 {offsets = [0, 96], sizes = [1, 32], strides = [1, 1]} : vector<1x128xf32> to vector<1x32xf32>
    %176 = arith.mulf %173, %121 : vector<1x32xf32>
    %177 = arith.mulf %172, %175 : vector<1x32xf32>
    %178 = arith.addf %176, %177 : vector<1x32xf32>
    %179 = math.tanh %178 : vector<1x32xf32>
    %180 = arith.mulf %174, %179 : vector<1x32xf32>
    %181 = arith.mulf %180, %4 : vector<1x32xf32>
    %182 = vector.shape_cast %181 : vector<1x32xf32> to vector<1x1x32xf32>
    %cst_49 = arith.constant dense<0.000000e+00> : vector<1xf32>
    %183 = vector.multi_reduction <add>, %182, %cst_49 [1, 2] : vector<1x1x32xf32> to vector<1xf32>
    %184 = vector.shape_cast %183 : vector<1xf32> to vector<1x1x1xf32>
    %185 = vector.extract %184[0, 0, 0] : f32 from vector<1x1x1xf32>
    %186 = arith.addf %185, %5 : f32
    %187 = vector.broadcast %c2_i32 : i32 to vector<1x8xi32>
    %188 = arith.cmpi eq, %3, %187 : vector<1x8xi32>
    %189 = vector.broadcast %186 : f32 to vector<1x8xf32>
    %190 = arith.select %188, %189, %133 : vector<1x8xi1>, vector<1x8xf32>
    %c3_i32 = arith.constant 3 : i32
    %191 = arith.index_cast %c3_i32 : i32 to index
    %192 = memref.load %arg1[%191] : memref<8xi32, #tpu.memory_space<smem>>
    %c0_i32_50 = arith.constant 0 : i32
    %193 = arith.cmpi ne, %192, %c0_i32_50 : i32
    %194 = arith.index_cast %c3_i32 : i32 to index
    %195 = memref.load %arg0[%194] : memref<8xf32, #tpu.memory_space<smem>>
    %196 = arith.select %193, %195, %186 : f32
    %197 = arith.index_cast %c3_i32 : i32 to index
    %c0_51 = arith.constant 0 : index
    %198 = vector.load %arg2[%197, %c0_51] : memref<8x128xf32, #tpu.memory_space<vmem>>, vector<1x128xf32>
    %199 = vector.broadcast %196 : f32 to vector<1x128xf32>
    %200 = arith.mulf %199, %6 : vector<1x128xf32>
    %201 = arith.addf %198, %200 : vector<1x128xf32>
    %cst_52 = arith.constant dense<0.000000e+00> : vector<1x128xf32>
    %202 = tpu.matmul %161, %8, %cst_52 {dimension_numbers = #tpu.dot_dimension_numbers<[1], [0], [0], [1], [0, 0, 1, 1], [], []>} : vector<1x32xf32>, vector<32x128xf32>, vector<1x128xf32> -> vector<1x128xf32>
    %203 = arith.addf %201, %202 : vector<1x128xf32>
    %204 = math.tanh %203 : vector<1x128xf32>
    %cst_53 = arith.constant 5.000000e-01 : f32
    %205 = vector.broadcast %cst_53 : f32 to vector<1x128xf32>
    %206 = arith.mulf %205, %204 : vector<1x128xf32>
    %cst_54 = arith.constant 5.000000e-01 : f32
    %207 = vector.broadcast %cst_54 : f32 to vector<1x128xf32>
    %208 = arith.addf %206, %207 : vector<1x128xf32>
    %209 = arith.select %2, %208, %204 : vector<1x128xi1>, vector<1x128xf32>
    %210 = vector.extract_strided_slice %209 {offsets = [0, 0], sizes = [1, 32], strides = [1, 1]} : vector<1x128xf32> to vector<1x32xf32>
    %211 = vector.extract_strided_slice %209 {offsets = [0, 32], sizes = [1, 32], strides = [1, 1]} : vector<1x128xf32> to vector<1x32xf32>
    %212 = vector.extract_strided_slice %209 {offsets = [0, 64], sizes = [1, 32], strides = [1, 1]} : vector<1x128xf32> to vector<1x32xf32>
    %213 = vector.extract_strided_slice %209 {offsets = [0, 96], sizes = [1, 32], strides = [1, 1]} : vector<1x128xf32> to vector<1x32xf32>
    %214 = arith.mulf %211, %159 : vector<1x32xf32>
    %215 = arith.mulf %210, %213 : vector<1x32xf32>
    %216 = arith.addf %214, %215 : vector<1x32xf32>
    %217 = math.tanh %216 : vector<1x32xf32>
    %218 = arith.mulf %212, %217 : vector<1x32xf32>
    %cst_55 = arith.constant dense<0.000000e+00> : vector<1x128xf32>
    %219 = tpu.matmul %218, %12, %cst_55 {dimension_numbers = #tpu.dot_dimension_numbers<[1], [0], [0], [1], [0, 0, 1, 1], [], []>} : vector<1x32xf32>, vector<32x128xf32>, vector<1x128xf32> -> vector<1x128xf32>
    %cst_56 = arith.constant dense<0.000000e+00> : vector<1x128xf32>
    %220 = tpu.matmul %180, %10, %cst_56 {dimension_numbers = #tpu.dot_dimension_numbers<[1], [0], [0], [1], [0, 0, 1, 1], [], []>} : vector<1x32xf32>, vector<32x128xf32>, vector<1x128xf32> -> vector<1x128xf32>
    %221 = arith.addf %219, %220 : vector<1x128xf32>
    %222 = arith.addf %221, %14 : vector<1x128xf32>
    %223 = math.tanh %222 : vector<1x128xf32>
    %cst_57 = arith.constant 5.000000e-01 : f32
    %224 = vector.broadcast %cst_57 : f32 to vector<1x128xf32>
    %225 = arith.mulf %224, %223 : vector<1x128xf32>
    %cst_58 = arith.constant 5.000000e-01 : f32
    %226 = vector.broadcast %cst_58 : f32 to vector<1x128xf32>
    %227 = arith.addf %225, %226 : vector<1x128xf32>
    %228 = arith.select %2, %227, %223 : vector<1x128xi1>, vector<1x128xf32>
    %229 = vector.extract_strided_slice %228 {offsets = [0, 0], sizes = [1, 32], strides = [1, 1]} : vector<1x128xf32> to vector<1x32xf32>
    %230 = vector.extract_strided_slice %228 {offsets = [0, 32], sizes = [1, 32], strides = [1, 1]} : vector<1x128xf32> to vector<1x32xf32>
    %231 = vector.extract_strided_slice %228 {offsets = [0, 64], sizes = [1, 32], strides = [1, 1]} : vector<1x128xf32> to vector<1x32xf32>
    %232 = vector.extract_strided_slice %228 {offsets = [0, 96], sizes = [1, 32], strides = [1, 1]} : vector<1x128xf32> to vector<1x32xf32>
    %233 = arith.mulf %230, %178 : vector<1x32xf32>
    %234 = arith.mulf %229, %232 : vector<1x32xf32>
    %235 = arith.addf %233, %234 : vector<1x32xf32>
    %236 = math.tanh %235 : vector<1x32xf32>
    %237 = arith.mulf %231, %236 : vector<1x32xf32>
    %238 = arith.mulf %237, %4 : vector<1x32xf32>
    %239 = vector.shape_cast %238 : vector<1x32xf32> to vector<1x1x32xf32>
    %cst_59 = arith.constant dense<0.000000e+00> : vector<1xf32>
    %240 = vector.multi_reduction <add>, %239, %cst_59 [1, 2] : vector<1x1x32xf32> to vector<1xf32>
    %241 = vector.shape_cast %240 : vector<1xf32> to vector<1x1x1xf32>
    %242 = vector.extract %241[0, 0, 0] : f32 from vector<1x1x1xf32>
    %243 = arith.addf %242, %5 : f32
    %244 = vector.broadcast %c3_i32 : i32 to vector<1x8xi32>
    %245 = arith.cmpi eq, %3, %244 : vector<1x8xi32>
    %246 = vector.broadcast %243 : f32 to vector<1x8xf32>
    %247 = arith.select %245, %246, %190 : vector<1x8xi1>, vector<1x8xf32>
    %c4_i32 = arith.constant 4 : i32
    %248 = arith.index_cast %c4_i32 : i32 to index
    %249 = memref.load %arg1[%248] : memref<8xi32, #tpu.memory_space<smem>>
    %c0_i32_60 = arith.constant 0 : i32
    %250 = arith.cmpi ne, %249, %c0_i32_60 : i32
    %251 = arith.index_cast %c4_i32 : i32 to index
    %252 = memref.load %arg0[%251] : memref<8xf32, #tpu.memory_space<smem>>
    %253 = arith.select %250, %252, %243 : f32
    %254 = arith.index_cast %c4_i32 : i32 to index
    %c0_61 = arith.constant 0 : index
    %255 = vector.load %arg2[%254, %c0_61] : memref<8x128xf32, #tpu.memory_space<vmem>>, vector<1x128xf32>
    %256 = vector.broadcast %253 : f32 to vector<1x128xf32>
    %257 = arith.mulf %256, %6 : vector<1x128xf32>
    %258 = arith.addf %255, %257 : vector<1x128xf32>
    %cst_62 = arith.constant dense<0.000000e+00> : vector<1x128xf32>
    %259 = tpu.matmul %218, %8, %cst_62 {dimension_numbers = #tpu.dot_dimension_numbers<[1], [0], [0], [1], [0, 0, 1, 1], [], []>} : vector<1x32xf32>, vector<32x128xf32>, vector<1x128xf32> -> vector<1x128xf32>
    %260 = arith.addf %258, %259 : vector<1x128xf32>
    %261 = math.tanh %260 : vector<1x128xf32>
    %cst_63 = arith.constant 5.000000e-01 : f32
    %262 = vector.broadcast %cst_63 : f32 to vector<1x128xf32>
    %263 = arith.mulf %262, %261 : vector<1x128xf32>
    %cst_64 = arith.constant 5.000000e-01 : f32
    %264 = vector.broadcast %cst_64 : f32 to vector<1x128xf32>
    %265 = arith.addf %263, %264 : vector<1x128xf32>
    %266 = arith.select %2, %265, %261 : vector<1x128xi1>, vector<1x128xf32>
    %267 = vector.extract_strided_slice %266 {offsets = [0, 0], sizes = [1, 32], strides = [1, 1]} : vector<1x128xf32> to vector<1x32xf32>
    %268 = vector.extract_strided_slice %266 {offsets = [0, 32], sizes = [1, 32], strides = [1, 1]} : vector<1x128xf32> to vector<1x32xf32>
    %269 = vector.extract_strided_slice %266 {offsets = [0, 64], sizes = [1, 32], strides = [1, 1]} : vector<1x128xf32> to vector<1x32xf32>
    %270 = vector.extract_strided_slice %266 {offsets = [0, 96], sizes = [1, 32], strides = [1, 1]} : vector<1x128xf32> to vector<1x32xf32>
    %271 = arith.mulf %268, %216 : vector<1x32xf32>
    %272 = arith.mulf %267, %270 : vector<1x32xf32>
    %273 = arith.addf %271, %272 : vector<1x32xf32>
    %274 = math.tanh %273 : vector<1x32xf32>
    %275 = arith.mulf %269, %274 : vector<1x32xf32>
    %cst_65 = arith.constant dense<0.000000e+00> : vector<1x128xf32>
    %276 = tpu.matmul %275, %12, %cst_65 {dimension_numbers = #tpu.dot_dimension_numbers<[1], [0], [0], [1], [0, 0, 1, 1], [], []>} : vector<1x32xf32>, vector<32x128xf32>, vector<1x128xf32> -> vector<1x128xf32>
    %cst_66 = arith.constant dense<0.000000e+00> : vector<1x128xf32>
    %277 = tpu.matmul %237, %10, %cst_66 {dimension_numbers = #tpu.dot_dimension_numbers<[1], [0], [0], [1], [0, 0, 1, 1], [], []>} : vector<1x32xf32>, vector<32x128xf32>, vector<1x128xf32> -> vector<1x128xf32>
    %278 = arith.addf %276, %277 : vector<1x128xf32>
    %279 = arith.addf %278, %14 : vector<1x128xf32>
    %280 = math.tanh %279 : vector<1x128xf32>
    %cst_67 = arith.constant 5.000000e-01 : f32
    %281 = vector.broadcast %cst_67 : f32 to vector<1x128xf32>
    %282 = arith.mulf %281, %280 : vector<1x128xf32>
    %cst_68 = arith.constant 5.000000e-01 : f32
    %283 = vector.broadcast %cst_68 : f32 to vector<1x128xf32>
    %284 = arith.addf %282, %283 : vector<1x128xf32>
    %285 = arith.select %2, %284, %280 : vector<1x128xi1>, vector<1x128xf32>
    %286 = vector.extract_strided_slice %285 {offsets = [0, 0], sizes = [1, 32], strides = [1, 1]} : vector<1x128xf32> to vector<1x32xf32>
    %287 = vector.extract_strided_slice %285 {offsets = [0, 32], sizes = [1, 32], strides = [1, 1]} : vector<1x128xf32> to vector<1x32xf32>
    %288 = vector.extract_strided_slice %285 {offsets = [0, 64], sizes = [1, 32], strides = [1, 1]} : vector<1x128xf32> to vector<1x32xf32>
    %289 = vector.extract_strided_slice %285 {offsets = [0, 96], sizes = [1, 32], strides = [1, 1]} : vector<1x128xf32> to vector<1x32xf32>
    %290 = arith.mulf %287, %235 : vector<1x32xf32>
    %291 = arith.mulf %286, %289 : vector<1x32xf32>
    %292 = arith.addf %290, %291 : vector<1x32xf32>
    %293 = math.tanh %292 : vector<1x32xf32>
    %294 = arith.mulf %288, %293 : vector<1x32xf32>
    %295 = arith.mulf %294, %4 : vector<1x32xf32>
    %296 = vector.shape_cast %295 : vector<1x32xf32> to vector<1x1x32xf32>
    %cst_69 = arith.constant dense<0.000000e+00> : vector<1xf32>
    %297 = vector.multi_reduction <add>, %296, %cst_69 [1, 2] : vector<1x1x32xf32> to vector<1xf32>
    %298 = vector.shape_cast %297 : vector<1xf32> to vector<1x1x1xf32>
    %299 = vector.extract %298[0, 0, 0] : f32 from vector<1x1x1xf32>
    %300 = arith.addf %299, %5 : f32
    %301 = vector.broadcast %c4_i32 : i32 to vector<1x8xi32>
    %302 = arith.cmpi eq, %3, %301 : vector<1x8xi32>
    %303 = vector.broadcast %300 : f32 to vector<1x8xf32>
    %304 = arith.select %302, %303, %247 : vector<1x8xi1>, vector<1x8xf32>
    %c5_i32 = arith.constant 5 : i32
    %305 = arith.index_cast %c5_i32 : i32 to index
    %306 = memref.load %arg1[%305] : memref<8xi32, #tpu.memory_space<smem>>
    %c0_i32_70 = arith.constant 0 : i32
    %307 = arith.cmpi ne, %306, %c0_i32_70 : i32
    %308 = arith.index_cast %c5_i32 : i32 to index
    %309 = memref.load %arg0[%308] : memref<8xf32, #tpu.memory_space<smem>>
    %310 = arith.select %307, %309, %300 : f32
    %311 = arith.index_cast %c5_i32 : i32 to index
    %c0_71 = arith.constant 0 : index
    %312 = vector.load %arg2[%311, %c0_71] : memref<8x128xf32, #tpu.memory_space<vmem>>, vector<1x128xf32>
    %313 = vector.broadcast %310 : f32 to vector<1x128xf32>
    %314 = arith.mulf %313, %6 : vector<1x128xf32>
    %315 = arith.addf %312, %314 : vector<1x128xf32>
    %cst_72 = arith.constant dense<0.000000e+00> : vector<1x128xf32>
    %316 = tpu.matmul %275, %8, %cst_72 {dimension_numbers = #tpu.dot_dimension_numbers<[1], [0], [0], [1], [0, 0, 1, 1], [], []>} : vector<1x32xf32>, vector<32x128xf32>, vector<1x128xf32> -> vector<1x128xf32>
    %317 = arith.addf %315, %316 : vector<1x128xf32>
    %318 = math.tanh %317 : vector<1x128xf32>
    %cst_73 = arith.constant 5.000000e-01 : f32
    %319 = vector.broadcast %cst_73 : f32 to vector<1x128xf32>
    %320 = arith.mulf %319, %318 : vector<1x128xf32>
    %cst_74 = arith.constant 5.000000e-01 : f32
    %321 = vector.broadcast %cst_74 : f32 to vector<1x128xf32>
    %322 = arith.addf %320, %321 : vector<1x128xf32>
    %323 = arith.select %2, %322, %318 : vector<1x128xi1>, vector<1x128xf32>
    %324 = vector.extract_strided_slice %323 {offsets = [0, 0], sizes = [1, 32], strides = [1, 1]} : vector<1x128xf32> to vector<1x32xf32>
    %325 = vector.extract_strided_slice %323 {offsets = [0, 32], sizes = [1, 32], strides = [1, 1]} : vector<1x128xf32> to vector<1x32xf32>
    %326 = vector.extract_strided_slice %323 {offsets = [0, 64], sizes = [1, 32], strides = [1, 1]} : vector<1x128xf32> to vector<1x32xf32>
    %327 = vector.extract_strided_slice %323 {offsets = [0, 96], sizes = [1, 32], strides = [1, 1]} : vector<1x128xf32> to vector<1x32xf32>
    %328 = arith.mulf %325, %273 : vector<1x32xf32>
    %329 = arith.mulf %324, %327 : vector<1x32xf32>
    %330 = arith.addf %328, %329 : vector<1x32xf32>
    %331 = math.tanh %330 : vector<1x32xf32>
    %332 = arith.mulf %326, %331 : vector<1x32xf32>
    %cst_75 = arith.constant dense<0.000000e+00> : vector<1x128xf32>
    %333 = tpu.matmul %332, %12, %cst_75 {dimension_numbers = #tpu.dot_dimension_numbers<[1], [0], [0], [1], [0, 0, 1, 1], [], []>} : vector<1x32xf32>, vector<32x128xf32>, vector<1x128xf32> -> vector<1x128xf32>
    %cst_76 = arith.constant dense<0.000000e+00> : vector<1x128xf32>
    %334 = tpu.matmul %294, %10, %cst_76 {dimension_numbers = #tpu.dot_dimension_numbers<[1], [0], [0], [1], [0, 0, 1, 1], [], []>} : vector<1x32xf32>, vector<32x128xf32>, vector<1x128xf32> -> vector<1x128xf32>
    %335 = arith.addf %333, %334 : vector<1x128xf32>
    %336 = arith.addf %335, %14 : vector<1x128xf32>
    %337 = math.tanh %336 : vector<1x128xf32>
    %cst_77 = arith.constant 5.000000e-01 : f32
    %338 = vector.broadcast %cst_77 : f32 to vector<1x128xf32>
    %339 = arith.mulf %338, %337 : vector<1x128xf32>
    %cst_78 = arith.constant 5.000000e-01 : f32
    %340 = vector.broadcast %cst_78 : f32 to vector<1x128xf32>
    %341 = arith.addf %339, %340 : vector<1x128xf32>
    %342 = arith.select %2, %341, %337 : vector<1x128xi1>, vector<1x128xf32>
    %343 = vector.extract_strided_slice %342 {offsets = [0, 0], sizes = [1, 32], strides = [1, 1]} : vector<1x128xf32> to vector<1x32xf32>
    %344 = vector.extract_strided_slice %342 {offsets = [0, 32], sizes = [1, 32], strides = [1, 1]} : vector<1x128xf32> to vector<1x32xf32>
    %345 = vector.extract_strided_slice %342 {offsets = [0, 64], sizes = [1, 32], strides = [1, 1]} : vector<1x128xf32> to vector<1x32xf32>
    %346 = vector.extract_strided_slice %342 {offsets = [0, 96], sizes = [1, 32], strides = [1, 1]} : vector<1x128xf32> to vector<1x32xf32>
    %347 = arith.mulf %344, %292 : vector<1x32xf32>
    %348 = arith.mulf %343, %346 : vector<1x32xf32>
    %349 = arith.addf %347, %348 : vector<1x32xf32>
    %350 = math.tanh %349 : vector<1x32xf32>
    %351 = arith.mulf %345, %350 : vector<1x32xf32>
    %352 = arith.mulf %351, %4 : vector<1x32xf32>
    %353 = vector.shape_cast %352 : vector<1x32xf32> to vector<1x1x32xf32>
    %cst_79 = arith.constant dense<0.000000e+00> : vector<1xf32>
    %354 = vector.multi_reduction <add>, %353, %cst_79 [1, 2] : vector<1x1x32xf32> to vector<1xf32>
    %355 = vector.shape_cast %354 : vector<1xf32> to vector<1x1x1xf32>
    %356 = vector.extract %355[0, 0, 0] : f32 from vector<1x1x1xf32>
    %357 = arith.addf %356, %5 : f32
    %358 = vector.broadcast %c5_i32 : i32 to vector<1x8xi32>
    %359 = arith.cmpi eq, %3, %358 : vector<1x8xi32>
    %360 = vector.broadcast %357 : f32 to vector<1x8xf32>
    %361 = arith.select %359, %360, %304 : vector<1x8xi1>, vector<1x8xf32>
    %c6_i32 = arith.constant 6 : i32
    %362 = arith.index_cast %c6_i32 : i32 to index
    %363 = memref.load %arg1[%362] : memref<8xi32, #tpu.memory_space<smem>>
    %c0_i32_80 = arith.constant 0 : i32
    %364 = arith.cmpi ne, %363, %c0_i32_80 : i32
    %365 = arith.index_cast %c6_i32 : i32 to index
    %366 = memref.load %arg0[%365] : memref<8xf32, #tpu.memory_space<smem>>
    %367 = arith.select %364, %366, %357 : f32
    %368 = arith.index_cast %c6_i32 : i32 to index
    %c0_81 = arith.constant 0 : index
    %369 = vector.load %arg2[%368, %c0_81] : memref<8x128xf32, #tpu.memory_space<vmem>>, vector<1x128xf32>
    %370 = vector.broadcast %367 : f32 to vector<1x128xf32>
    %371 = arith.mulf %370, %6 : vector<1x128xf32>
    %372 = arith.addf %369, %371 : vector<1x128xf32>
    %cst_82 = arith.constant dense<0.000000e+00> : vector<1x128xf32>
    %373 = tpu.matmul %332, %8, %cst_82 {dimension_numbers = #tpu.dot_dimension_numbers<[1], [0], [0], [1], [0, 0, 1, 1], [], []>} : vector<1x32xf32>, vector<32x128xf32>, vector<1x128xf32> -> vector<1x128xf32>
    %374 = arith.addf %372, %373 : vector<1x128xf32>
    %375 = math.tanh %374 : vector<1x128xf32>
    %cst_83 = arith.constant 5.000000e-01 : f32
    %376 = vector.broadcast %cst_83 : f32 to vector<1x128xf32>
    %377 = arith.mulf %376, %375 : vector<1x128xf32>
    %cst_84 = arith.constant 5.000000e-01 : f32
    %378 = vector.broadcast %cst_84 : f32 to vector<1x128xf32>
    %379 = arith.addf %377, %378 : vector<1x128xf32>
    %380 = arith.select %2, %379, %375 : vector<1x128xi1>, vector<1x128xf32>
    %381 = vector.extract_strided_slice %380 {offsets = [0, 0], sizes = [1, 32], strides = [1, 1]} : vector<1x128xf32> to vector<1x32xf32>
    %382 = vector.extract_strided_slice %380 {offsets = [0, 32], sizes = [1, 32], strides = [1, 1]} : vector<1x128xf32> to vector<1x32xf32>
    %383 = vector.extract_strided_slice %380 {offsets = [0, 64], sizes = [1, 32], strides = [1, 1]} : vector<1x128xf32> to vector<1x32xf32>
    %384 = vector.extract_strided_slice %380 {offsets = [0, 96], sizes = [1, 32], strides = [1, 1]} : vector<1x128xf32> to vector<1x32xf32>
    %385 = arith.mulf %382, %330 : vector<1x32xf32>
    %386 = arith.mulf %381, %384 : vector<1x32xf32>
    %387 = arith.addf %385, %386 : vector<1x32xf32>
    %388 = math.tanh %387 : vector<1x32xf32>
    %389 = arith.mulf %383, %388 : vector<1x32xf32>
    %cst_85 = arith.constant dense<0.000000e+00> : vector<1x128xf32>
    %390 = tpu.matmul %389, %12, %cst_85 {dimension_numbers = #tpu.dot_dimension_numbers<[1], [0], [0], [1], [0, 0, 1, 1], [], []>} : vector<1x32xf32>, vector<32x128xf32>, vector<1x128xf32> -> vector<1x128xf32>
    %cst_86 = arith.constant dense<0.000000e+00> : vector<1x128xf32>
    %391 = tpu.matmul %351, %10, %cst_86 {dimension_numbers = #tpu.dot_dimension_numbers<[1], [0], [0], [1], [0, 0, 1, 1], [], []>} : vector<1x32xf32>, vector<32x128xf32>, vector<1x128xf32> -> vector<1x128xf32>
    %392 = arith.addf %390, %391 : vector<1x128xf32>
    %393 = arith.addf %392, %14 : vector<1x128xf32>
    %394 = math.tanh %393 : vector<1x128xf32>
    %cst_87 = arith.constant 5.000000e-01 : f32
    %395 = vector.broadcast %cst_87 : f32 to vector<1x128xf32>
    %396 = arith.mulf %395, %394 : vector<1x128xf32>
    %cst_88 = arith.constant 5.000000e-01 : f32
    %397 = vector.broadcast %cst_88 : f32 to vector<1x128xf32>
    %398 = arith.addf %396, %397 : vector<1x128xf32>
    %399 = arith.select %2, %398, %394 : vector<1x128xi1>, vector<1x128xf32>
    %400 = vector.extract_strided_slice %399 {offsets = [0, 0], sizes = [1, 32], strides = [1, 1]} : vector<1x128xf32> to vector<1x32xf32>
    %401 = vector.extract_strided_slice %399 {offsets = [0, 32], sizes = [1, 32], strides = [1, 1]} : vector<1x128xf32> to vector<1x32xf32>
    %402 = vector.extract_strided_slice %399 {offsets = [0, 64], sizes = [1, 32], strides = [1, 1]} : vector<1x128xf32> to vector<1x32xf32>
    %403 = vector.extract_strided_slice %399 {offsets = [0, 96], sizes = [1, 32], strides = [1, 1]} : vector<1x128xf32> to vector<1x32xf32>
    %404 = arith.mulf %401, %349 : vector<1x32xf32>
    %405 = arith.mulf %400, %403 : vector<1x32xf32>
    %406 = arith.addf %404, %405 : vector<1x32xf32>
    %407 = math.tanh %406 : vector<1x32xf32>
    %408 = arith.mulf %402, %407 : vector<1x32xf32>
    %409 = arith.mulf %408, %4 : vector<1x32xf32>
    %410 = vector.shape_cast %409 : vector<1x32xf32> to vector<1x1x32xf32>
    %cst_89 = arith.constant dense<0.000000e+00> : vector<1xf32>
    %411 = vector.multi_reduction <add>, %410, %cst_89 [1, 2] : vector<1x1x32xf32> to vector<1xf32>
    %412 = vector.shape_cast %411 : vector<1xf32> to vector<1x1x1xf32>
    %413 = vector.extract %412[0, 0, 0] : f32 from vector<1x1x1xf32>
    %414 = arith.addf %413, %5 : f32
    %415 = vector.broadcast %c6_i32 : i32 to vector<1x8xi32>
    %416 = arith.cmpi eq, %3, %415 : vector<1x8xi32>
    %417 = vector.broadcast %414 : f32 to vector<1x8xf32>
    %418 = arith.select %416, %417, %361 : vector<1x8xi1>, vector<1x8xf32>
    %c7_i32 = arith.constant 7 : i32
    %419 = arith.index_cast %c7_i32 : i32 to index
    %420 = memref.load %arg1[%419] : memref<8xi32, #tpu.memory_space<smem>>
    %c0_i32_90 = arith.constant 0 : i32
    %421 = arith.cmpi ne, %420, %c0_i32_90 : i32
    %422 = arith.index_cast %c7_i32 : i32 to index
    %423 = memref.load %arg0[%422] : memref<8xf32, #tpu.memory_space<smem>>
    %424 = arith.select %421, %423, %414 : f32
    %425 = arith.index_cast %c7_i32 : i32 to index
    %c0_91 = arith.constant 0 : index
    %426 = vector.load %arg2[%425, %c0_91] : memref<8x128xf32, #tpu.memory_space<vmem>>, vector<1x128xf32>
    %427 = vector.broadcast %424 : f32 to vector<1x128xf32>
    %428 = arith.mulf %427, %6 : vector<1x128xf32>
    %429 = arith.addf %426, %428 : vector<1x128xf32>
    %cst_92 = arith.constant dense<0.000000e+00> : vector<1x128xf32>
    %430 = tpu.matmul %389, %8, %cst_92 {dimension_numbers = #tpu.dot_dimension_numbers<[1], [0], [0], [1], [0, 0, 1, 1], [], []>} : vector<1x32xf32>, vector<32x128xf32>, vector<1x128xf32> -> vector<1x128xf32>
    %431 = arith.addf %429, %430 : vector<1x128xf32>
    %432 = math.tanh %431 : vector<1x128xf32>
    %cst_93 = arith.constant 5.000000e-01 : f32
    %433 = vector.broadcast %cst_93 : f32 to vector<1x128xf32>
    %434 = arith.mulf %433, %432 : vector<1x128xf32>
    %cst_94 = arith.constant 5.000000e-01 : f32
    %435 = vector.broadcast %cst_94 : f32 to vector<1x128xf32>
    %436 = arith.addf %434, %435 : vector<1x128xf32>
    %437 = arith.select %2, %436, %432 : vector<1x128xi1>, vector<1x128xf32>
    %438 = vector.extract_strided_slice %437 {offsets = [0, 0], sizes = [1, 32], strides = [1, 1]} : vector<1x128xf32> to vector<1x32xf32>
    %439 = vector.extract_strided_slice %437 {offsets = [0, 32], sizes = [1, 32], strides = [1, 1]} : vector<1x128xf32> to vector<1x32xf32>
    %440 = vector.extract_strided_slice %437 {offsets = [0, 64], sizes = [1, 32], strides = [1, 1]} : vector<1x128xf32> to vector<1x32xf32>
    %441 = vector.extract_strided_slice %437 {offsets = [0, 96], sizes = [1, 32], strides = [1, 1]} : vector<1x128xf32> to vector<1x32xf32>
    %442 = arith.mulf %439, %387 : vector<1x32xf32>
    %443 = arith.mulf %438, %441 : vector<1x32xf32>
    %444 = arith.addf %442, %443 : vector<1x32xf32>
    %445 = math.tanh %444 : vector<1x32xf32>
    %446 = arith.mulf %440, %445 : vector<1x32xf32>
    %cst_95 = arith.constant dense<0.000000e+00> : vector<1x128xf32>
    %447 = tpu.matmul %446, %12, %cst_95 {dimension_numbers = #tpu.dot_dimension_numbers<[1], [0], [0], [1], [0, 0, 1, 1], [], []>} : vector<1x32xf32>, vector<32x128xf32>, vector<1x128xf32> -> vector<1x128xf32>
    %cst_96 = arith.constant dense<0.000000e+00> : vector<1x128xf32>
    %448 = tpu.matmul %408, %10, %cst_96 {dimension_numbers = #tpu.dot_dimension_numbers<[1], [0], [0], [1], [0, 0, 1, 1], [], []>} : vector<1x32xf32>, vector<32x128xf32>, vector<1x128xf32> -> vector<1x128xf32>
    %449 = arith.addf %447, %448 : vector<1x128xf32>
    %450 = arith.addf %449, %14 : vector<1x128xf32>
    %451 = math.tanh %450 : vector<1x128xf32>
    %cst_97 = arith.constant 5.000000e-01 : f32
    %452 = vector.broadcast %cst_97 : f32 to vector<1x128xf32>
    %453 = arith.mulf %452, %451 : vector<1x128xf32>
    %cst_98 = arith.constant 5.000000e-01 : f32
    %454 = vector.broadcast %cst_98 : f32 to vector<1x128xf32>
    %455 = arith.addf %453, %454 : vector<1x128xf32>
    %456 = arith.select %2, %455, %451 : vector<1x128xi1>, vector<1x128xf32>
    %457 = vector.extract_strided_slice %456 {offsets = [0, 0], sizes = [1, 32], strides = [1, 1]} : vector<1x128xf32> to vector<1x32xf32>
    %458 = vector.extract_strided_slice %456 {offsets = [0, 32], sizes = [1, 32], strides = [1, 1]} : vector<1x128xf32> to vector<1x32xf32>
    %459 = vector.extract_strided_slice %456 {offsets = [0, 64], sizes = [1, 32], strides = [1, 1]} : vector<1x128xf32> to vector<1x32xf32>
    %460 = vector.extract_strided_slice %456 {offsets = [0, 96], sizes = [1, 32], strides = [1, 1]} : vector<1x128xf32> to vector<1x32xf32>
    %461 = arith.mulf %458, %406 : vector<1x32xf32>
    %462 = arith.mulf %457, %460 : vector<1x32xf32>
    %463 = arith.addf %461, %462 : vector<1x32xf32>
    %464 = math.tanh %463 : vector<1x32xf32>
    %465 = arith.mulf %459, %464 : vector<1x32xf32>
    %466 = arith.mulf %465, %4 : vector<1x32xf32>
    %467 = vector.shape_cast %466 : vector<1x32xf32> to vector<1x1x32xf32>
    %cst_99 = arith.constant dense<0.000000e+00> : vector<1xf32>
    %468 = vector.multi_reduction <add>, %467, %cst_99 [1, 2] : vector<1x1x32xf32> to vector<1xf32>
    %469 = vector.shape_cast %468 : vector<1xf32> to vector<1x1x1xf32>
    %470 = vector.extract %469[0, 0, 0] : f32 from vector<1x1x1xf32>
    %471 = arith.addf %470, %5 : f32
    %472 = vector.broadcast %c7_i32 : i32 to vector<1x8xi32>
    %473 = arith.cmpi eq, %3, %472 : vector<1x8xi32>
    %474 = vector.broadcast %471 : f32 to vector<1x8xf32>
    %475 = arith.select %473, %474, %418 : vector<1x8xi1>, vector<1x8xf32>
    %c8_i32 = arith.constant 8 : i32
    %c0_100 = arith.constant 0 : index
    %c0_101 = arith.constant 0 : index
    %476 = vector.load %arg9[%c0_100, %c0_101] : memref<1x8xf32, #tpu.memory_space<vmem>>, vector<1x8xf32>
    tpu.vector_store %arg9[%c0_100, %c0_101], %475 {strides = array<i32>} : memref<1x8xf32, #tpu.memory_space<vmem>>, vector<1x8xf32>,
    return
  }
}

</mosaic_0001>

<bundles_post_ra>
// kernel: tpu_custom_call.1
= control target key start
LH: loop header
LB: loop body
LE: loop exit
PB: predicated region body
PF: predicated region fallthrough
CT: control target
= control target key end

     0   :  { %15 = vsyncpa [#allocation7], 0  ;;  %s3812_s0 = inlined_call_operand.vmem [shape: f32[8], index: 0, kind: input, shape index: {}]   ;;  %s3813_s1 = inlined_call_operand.hbm [shape: s32[8], index: 1, kind: input, shape index: {}]   ;;  %s3814_s2 = inlined_call_operand.vmem [shape: f32[8,128], index: 2, kind: input, shape index: {}]   ;;  %s3815_s3 = inlined_call_operand.vmem [shape: f32[1,128], index: 3, kind: input, shape index: {}]   ;;  %s3816_s4 = inlined_call_operand.hbm [shape: f32[2,32,128], index: 4, kind: input, shape index: {}]   ;;  %s3817_s5 = inlined_call_operand.hbm [shape: f32[2,32,128], index: 5, kind: input, shape index: {}]   ;;  %s3818_s6 = inlined_call_operand.vmem [shape: f32[2,1,128], index: 6, kind: input, shape index: {}]   ;;  %s3819_s7 = inlined_call_operand.vmem [shape: f32[1,32], index: 7, kind: input, shape index: {}]   ;;  %s3820_s8 = inlined_call_operand.<no memory space> [shape: f32[1], index: 8, kind: input, shape index: {}]   ;;  %s3821_s9 = inlined_call_operand.hbm [shape: f32[1,8], index: 9, kind: output, shape index: {}]  }
   0x1   :  { %16 = vsyncpa [#allocation6], 0 }
   0x2   :  { %17 = vsyncpa [#allocation4], 0 }
   0x3   :  { %18 = vsyncpa [#allocation11], 0 }
   0x4   :  { %19 = vsyncpa [#allocation5], 0  ;;  %s26_s11 = sshll.u32 %s3812_s0, 4  ;;  %s27_s11 = int_to_ptr.vmem [resolvable:$true] %s26_s11 }
   0x5   :  { %s3123_s12 = scalar_lea.vmem %s27_s11, 16  ;;  %p3128_p1 = scmp.lt.s32.totalorder %s27_s11, %s27_s11 }
   0x6   :  { %p3124_p0 = scmp.ne.s32.totalorder %s27_s11, %s3123_s12  ;;  %p3129_p2 = scmp.lt.s32.totalorder %s3123_s12, %s3123_s12 }
   0x8   :  { %p3130_p3 = por %p3129_p2, %p3128_p1 }
   0xa   :  { %p3131_p4 = pnand %p3130_p3, %p3124_p0 }
   0xc   :  { %3134 = shalt.err (!%p3131_p4)
}
   0xd   :  { %s3221_s13 = smov [#allocation3]   ;;  %s3135_s16 = scalar_lea.hbm %s3813_s1, 16 }
   0xe   :  { %29 = dma.vmem_to_smem %s27_s11, 16, %s3221_s13, [#allocation7]  }
   0xf   :  { %p3136_p5 = scmp.ne.s32.totalorder %s3813_s1, %s3135_s16  ;;  %p3139_p6 = scmp.lt.u32.totalorder %s3135_s16, %s3813_s1 }
  0x11   :  { %p3141_p7 = pnand %p3139_p6, %p3136_p5 }
  0x13   :  { %3144 = shalt.err (!%p3141_p7)
}
  0x14   :  { %s3222_s20 = smov [#allocation8]   ;;  %s3223_s23 = smov [#allocation9]  }
  0x15   :  { %37 = dma.hbm_to_smem %s3813_s1, 16, %s3222_s20, [#allocation6]  }
  0x16   :  { %s47_s24 = sshll.u32 %s3223_s23, 4  ;;  %s3145_s27 = scalar_lea.hbm %s3816_s4, 1024  ;;  %s48_s24 = int_to_ptr.vmem [resolvable:$true] %s47_s24 }
  0x17   :  { %p3146_p8 = scmp.ne.s32.totalorder %s3816_s4, %s3145_s27  ;;  %p3149_p9 = scmp.lt.u32.totalorder %s3145_s27, %s3816_s4 }
  0x19   :  { %p3151_p10 = pnand %p3149_p9, %p3146_p8 }
  0x1b   :  { %3154 = shalt.err (!%p3151_p10)
}
  0x1c   :  { %s3155_s11 = scalar_lea.vmem %s48_s24, 1024  ;;  %p3160_p12 = scmp.lt.s32.totalorder %s48_s24, %s48_s24 }
  0x1d   :  { %p3156_p11 = scmp.ne.s32.totalorder %s48_s24, %s3155_s11  ;;  %p3161_p13 = scmp.lt.s32.totalorder %s3155_s11, %s3155_s11 }
  0x1f   :  { %p3162_p0 = por %p3161_p13, %p3160_p12 }
  0x21   :  { %p3163_p1 = pnand %p3162_p0, %p3156_p11 }
  0x23   :  { %3166 = shalt.err (!%p3163_p1)
}
  0x24   :  { %s3224_s1 = smov 128   ;;  %s3225_s12 = smov 8  }
  0x25   :  { %53 = dma.hbm_to_vmem [thread:$0]  %s3816_s4, 1024, %s48_s24, [#allocation4], %s3224_s1, %s3224_s1, %s3225_s12  }
  0x26   :  { %s3226_s15 = smov [#allocation10]   ;;  %s3167_s19 = scalar_lea.hbm %s3817_s5, 1024 }
  0x27   :  { %s59_s16 = sshll.u32 %s3226_s15, 4  ;;  %p3168_p2 = scmp.ne.s32.totalorder %s3817_s5, %s3167_s19  ;;  %s60_s16 = int_to_ptr.vmem [resolvable:$true] %s59_s16 }
  0x28   :  { %p3171_p3 = scmp.lt.u32.totalorder %s3167_s19, %s3817_s5 }
  0x2a   :  { %p3173_p4 = pnand %p3171_p3, %p3168_p2 }
  0x2c   :  { %3176 = shalt.err (!%p3173_p4)
}
  0x2d   :  { %s3177_s23 = scalar_lea.vmem %s60_s16, 1024  ;;  %p3182_p6 = scmp.lt.s32.totalorder %s60_s16, %s60_s16 }
  0x2e   :  { %p3178_p5 = scmp.ne.s32.totalorder %s60_s16, %s3177_s23  ;;  %p3183_p7 = scmp.lt.s32.totalorder %s3177_s23, %s3177_s23 }
  0x30   :  { %p3184_p8 = por %p3183_p7, %p3182_p6 }
  0x32   :  { %p3185_p9 = pnand %p3184_p8, %p3178_p5 }
  0x34   :  { %3188 = shalt.err (!%p3185_p9)
}
  0x35   :  { %65 = dma.hbm_to_vmem [thread:$0]  %s3817_s5, 1024, %s60_s16, [#allocation11], %s3224_s1, %s3224_s1, %s3225_s12  }
  0x36   :  { %3211 = dma.done.wait [#allocation7], 16  }
  0x37   :  { %3212 = vsyncadd [#allocation7], 4294967280 }
  0x38   :  { %3213 = dma.done.wait [#allocation6], 16  }
  0x39   :  { %3214 = vsyncadd [#allocation6], 4294967280 }
  0x3a   :  { %3215 = dma.done.wait [#allocation4], 1024  }
  0x3b   :  { %3216 = vsyncadd [#allocation4], 4294966272 }
  0x3c   :  { %3217 = dma.done.wait [#allocation11], 1024  }
  0x3d   :  { %3218 = vsyncadd [#allocation11], 4294966272 }
  0x3e   :  { %84 = sfence }
  0x3f   :  { %v91_v0 = vld [vmem:[#allocation10] sm:$0xff]  ;;  %v92_v1 = vld [vmem:[#allocation10 + $0x8] sm:$0xff]  ;;  %v93_v2 = vld [vmem:[#allocation10 + $0x10] sm:$0xff]  ;;  %v3227_v3 = vmov 0.0|0.0   ;;  %vm3228_vm0 = vmmov 0   ;;  %v3229_v6 = vmov 0.0   ;;  %v85_v16 = vlaneseq }
  0x40   :  { %2885 = vmatprep.subr.bf16.mxu0 %v3227_v3  ;;  %v3323_v4 = vpack.c.bf16 %v92_v1, %v91_v0  ;;  %v94_v5 = vld [vmem:[#allocation10 + $0x18] sm:$0xff]  ;;  %2629 = vmatprep.mubr.msk.f32.mxu0 %vm3228_vm0, %v3229_v6  ;;  %s107_s5 = sld [smem:[#allocation8]]  ;;  %v3342_v8 = vld [vmem:[%s3815_s3] sm:$0x1]  ;;  %s3230_s30 = smov 32   ;;  %v97_v28 = vld [vmem:[#allocation10 + $0x28] sm:$0xff] }
  0x41   :  { %2891 = vmatprep.subr.bf16.mxu1 %v3227_v3  ;;  %2640 = vmatprep.mubr.msk.f32.mxu1 %vm3228_vm0, %v3229_v6  ;;  %v3331_v7 = vpack.c.bf16 %v94_v5, %v93_v2  ;;  %s109_s25 = sld [smem:[#allocation3]]  ;;  %v111_v11 = vld [vmem:[%s3814_s2] sm:$0x1]  ;;  %v3348_v17 = vand.u32 127, %v85_v16  ;;  %v98_v29 = vld [vmem:[#allocation10 + $0x30] sm:$0xff]  ;;  %v99_v31 = vld [vmem:[#allocation10 + $0x38] sm:$0xff] }
  0x42   :  { %2887 = vmatpush3.bf16.msra.mxu0 %v3323_v4  ;;  %v96_v27 = vld [vmem:[#allocation10 + $0x20] sm:$0xff]  ;;  %v102_v33 = vld [vmem:[#allocation9 + $0x28] sm:$0xff]  ;;  %v103_v35 = vld [vmem:[#allocation9 + $0x30] sm:$0xff]  ;;  %v3363_v37 = vpack.c.bf16 %v99_v31, %v98_v29  ;;  %s3231_s10 = smov 64   ;;  %vm115_vm2 = vcmask 261120   ;;  %vm391_vm3 = vcmask 253952  }
  0x43   :  { %2888 = vmatprep.subr.bf16.mxu0 %v3227_v3  ;;  %vm87_vm1 = vcmp.lt.s32.totalorder %v3348_v17, 96  ;;  %v3358_v30 = vpack.c.bf16 %v97_v28, %v96_v27  ;;  %v101_v32 = vld [vmem:[#allocation9 + $0x20] sm:$0xff]  ;;  %v104_v36 = vld [vmem:[#allocation9 + $0x38] sm:$0xff]  ;;  %s2467_s14 = sld [smem:[#allocation3 + $0x1]]  ;;  %s2471_s20 = sld [smem:[#allocation8 + $0x2]]  ;;  %vm403_vm4 = vcmp.eq.s32.totalorder %v3348_v17, 0 }
  0x44   :  { %v3360_v34 = vpack.c.bf16 %v102_v33, %v101_v32  ;;  %v3367_v38 = vpack.c.bf16 %v104_v36, %v103_v35  ;;  %v3400_v45 = vld [vmem:[%s3818_s6 + $0x1] sm:$0x1]  ;;  %v2465_v58 = vld [vmem:[%s3819_s7] ss:$0 sm:$0xff]  ;;  %s2466_s7 = sld [smem:[#allocation8 + $0x1]]  ;;  %s2472_s21 = sld [smem:[#allocation3 + $0x2]] }
  0x45   :  { %2893 = vmatpush3.bf16.msra.mxu1 %v3358_v30  ;;  %vm694_vm5 = vcmp.eq.s32.totalorder %v3348_v17, 1  ;;  %s2476_s26 = sld [smem:[#allocation8 + $0x3]]  ;;  %vm985_vm6 = vcmp.eq.s32.totalorder %v3348_v17, 2  ;;  %vm1276_vm7 = vcmp.eq.s32.totalorder %v3348_v17, 3  ;;  %vm1567_vm8 = vcmp.eq.s32.totalorder %v3348_v17, 4  ;;  %s2497_s16 = sld [smem:[#allocation3 + $0x7]] }
  0x46   :  { %2890 = vmatpush3.bf16.msra.mxu0 %v3331_v7  ;;  %p108_p10 = scmp.ne.s32.totalorder %s107_s5, 0  ;;  %2894 = vmatprep.subr.bf16.mxu1 %v3227_v3  ;;  %s2477_s27 = sld [smem:[#allocation3 + $0x3]]  ;;  %vm1858_vm9 = vcmp.eq.s32.totalorder %v3348_v17, 5  ;;  %vm2149_vm10 = vcmp.eq.s32.totalorder %v3348_v17, 6  ;;  %vm2440_vm11 = vcmp.eq.s32.totalorder %v3348_v17, 7  ;;  %vm2443_vm12 = vcmask 57344  }
  0x47   :  { %2897 = vmatprep.subr.bf16.mxu0 %v3227_v3 }
  0x48   :  { %s3823_s25 = smov (!%p108_p10, %s109_s25), 0.0 }
  0x49   :  { %2630 = vmatmul.mubr.f32.vlgmr.msra.gmra.mrb[0].mxu0 %v3229_v6  ;;  %v112_v9 = vstv %s3823_s25  ;;  %2896 = vmatpush3.bf16.msra.mxu1 %v3363_v37  ;;  %p698_p12 = scmp.ne.s32.totalorder %s2471_s20, 0  ;;  %s2486_s20 = sld [smem:[#allocation8 + $0x5]] }
  0x4a   :  { %2651 = vmatprep.mubr.msk.f32.mxu0 %vm3228_vm0, %v3229_v6  ;;  %v113_v10 = vmul.f32 %v112_v9, %v3342_v8  ;;  %2899 = vmatpush3.bf16.msra.mxu0 %v3360_v34  ;;  %p407_p11 = scmp.ne.s32.totalorder %s2466_s7, 0  ;;  %s2481_s7 = sld [smem:[#allocation8 + $0x4]] }
  0x4b   :  { %2900 = vmatprep.subr.bf16.mxu0 %v3227_v3  ;;  %2903 = vmatprep.subr.bf16.mxu1 %v3227_v3  ;;  %p989_p13 = scmp.ne.s32.totalorder %s2476_s26, 0  ;;  %s2491_s26 = sld [smem:[#allocation8 + $0x6]] }
  0x4c   :  { %v114_v12 = vadd.f32 %v113_v10, %v111_v11  ;;  %2641 = vmatmul.mubr.f32.vlgmr.msra.gmra.mrb[0].mxu1 %v3229_v6 }
  0x4d   :  { %2905 = vmatpush3.bf16.msra.mxu1 %v3323_v4  ;;  %2662 = vmatprep.mubr.msk.f32.mxu1 %vm3228_vm0, %v3229_v6 }
  0x4e   :  { %2902 = vmatpush3.bf16.msra.mxu0 %v3367_v38  ;;  %2906 = vmatprep.subr.bf16.mxu1 %v3227_v3 }
  0x4f   :  { %2909 = vmatprep.subr.bf16.mxu0 %v3227_v3  ;;  %p1571_p1 = scmp.ne.s32.totalorder %s2486_s20, 0 }
  0x50   :  { %p1280_p0 = scmp.ne.s32.totalorder %s2481_s7, 0 }
  0x51   :  { %2908 = vmatpush3.bf16.msra.mxu1 %v3331_v7  ;;  %p1862_p2 = scmp.ne.s32.totalorder %s2491_s26, 0 }
  0x52   :  { %2915 = vmatprep.subr.bf16.mxu1 %v3227_v3 }
 0x11c   :  { %v185_v13 = vpop.f32.mrb[0].mxu0 }
 0x11d   :  { %v189_v14 = vadd.f32 %v185_v13, %v114_v12  ;;  %v2631_v15 = vpop.f32.mrb[1].mxu0 }
 0x11f   :  { %3057 = vtanh.f32 %v189_v14  ;;  %v277_v42 = vpop.f32.mrb[0].mxu1 }
 0x120   :  { %v2642_v43 = vpop.f32.mrb[1].mxu1 }
 0x129   :  { %v3058_v18 = vpop.eup %3057 }
 0x12a   :  { %v191_v19 = vmul.f32 0.5, %v3058_v18 }
 0x12c   :  { %v192_v20 = vadd.f32 0.5, %v191_v19 }
 0x12e   :  { %v193_v21 = vsel %vm87_vm1, %v192_v20, %v3058_v18  ;;  %v410_v18 = vld [vmem:[%s3814_s2 + $0x1] sm:$0x1] }
 0x12f   :  { %196 = vrot.lane.b32.xlu0 %v193_v21, %s3230_s30  ;;  %v194_v24 = vmul.f32 0.0, %v193_v21 }
 0x1a1   :  { %v197_v22 = vpop.permute.xlu0 %196 }
 0x1a2   :  { %v199_v23 = vmul.f32 %v197_v22, %v193_v21 }
 0x1a4   :  { %201 = vrot.lane.b32.xlu0 %v199_v23, %s3230_s30 }
 0x216   :  { %v202_v25 = vpop.permute.xlu0 %201 }
 0x217   :  { %v3355_v26 = vadd.f32 %v202_v25, %v194_v24 }
 0x219   :  { %3059 = vtanh.f32 %v3355_v26 }
 0x223   :  { %v3060_v39 = vpop.eup %3059 }
 0x224   :  { %207 = vrot.lane.b32.xlu1 %v3060_v39, %s3230_s30 }
 0x296   :  { %v208_v40 = vpop.permute.xlu1 %207 }
 0x297   :  { %v210_v41 = vmul.f32 %v208_v40, %v193_v21 }
 0x299   :  { %282 = vrot.lane.b32.xlu1 %v210_v41, %s3231_s10 }
 0x30b   :  { %v283_v44 = vpop.permute.xlu1 %282 }
 0x30c   :  { %2652 = vmatmul.mubr.msk.f32.vlgmr.msra.gmra.mrb[2].mxu0 %vm115_vm2, %v283_v44  ;;  %2663 = vmatmul.mubr.msk.f32.vlgmr.msra.gmra.mrb[2].mxu1 %vm115_vm2, %v283_v44 }
 0x30d   :  { %2911 = vmatpush3.bf16.msra.mxu0 %v3358_v30  ;;  %2673 = vmatprep.mubr.msk.f32.mxu0 %vm3228_vm0, %v3229_v6 }
 0x30e   :  { %2912 = vmatprep.subr.bf16.mxu0 %v3227_v3  ;;  %2917 = vmatpush3.bf16.msra.mxu1 %v3360_v34 }
 0x30f   :  { %2918 = vmatprep.subr.bf16.mxu1 %v3227_v3  ;;  %2684 = vmatprep.mubr.msk.f32.mxu1 %vm3228_vm0, %v3229_v6 }
 0x311   :  { %2914 = vmatpush3.bf16.msra.mxu0 %v3363_v37 }
 0x312   :  { %2921 = vmatprep.subr.bf16.mxu0 %v3227_v3  ;;  %2920 = vmatpush3.bf16.msra.mxu1 %v3367_v38 }
 0x313   :  { %2927 = vmatprep.subr.bf16.mxu1 %v3227_v3 }
 0x3df   :  { %v352_v46 = vpop.f32.mrb[2].mxu0  ;;  %v480_v47 = vpop.f32.mrb[2].mxu1 }
 0x3e0   :  { %v353_v48 = vadd.f32 %v352_v46, %v277_v42  ;;  %v2653_v49 = vpop.f32.mrb[3].mxu0  ;;  %v2664_v50 = vpop.f32.mrb[3].mxu1 }
 0x3e2   :  { %v356_v51 = vadd.f32 %v3400_v45, %v353_v48 }
 0x3e4   :  { %3061 = vtanh.f32 %v356_v51 }
 0x3ee   :  { %v3062_v52 = vpop.eup %3061 }
 0x3ef   :  { %v358_v53 = vmul.f32 0.5, %v3062_v52 }
 0x3f1   :  { %v359_v54 = vadd.f32 0.5, %v358_v53 }
 0x3f3   :  { %v360_v55 = vsel %vm87_vm1, %v359_v54, %v3062_v52 }
 0x3f4   :  { %363 = vrot.lane.b32.xlu0 %v360_v55, %s3230_s30  ;;  %v361_v59 = vmul.f32 0.0, %v360_v55 }
 0x466   :  { %v364_v56 = vpop.permute.xlu0 %363 }
 0x467   :  { %v366_v57 = vmul.f32 %v364_v56, %v360_v55 }
 0x469   :  { %368 = vrot.lane.b32.xlu1 %v366_v57, %s3230_s30 }
 0x46d   :  { %383 = vrot.lane.b32.xlu1 %v2465_v58, %s3231_s10 }
 0x4db   :  { %v369_v60 = vpop.permute.xlu1 %368 }
 0x4dc   :  { %v3411_v61 = vadd.f32 %v369_v60, %v361_v59 }
 0x4de   :  { %3063 = vtanh.f32 %v3411_v61 }
 0x4df   :  { %v3415_v0 = vpop.permute.xlu1 %383 }
 0x4e8   :  { %v3064_v62 = vpop.eup %3063 }
 0x4e9   :  { %374 = vrot.lane.b32.xlu0 %v3064_v62, %s3230_s30 }
 0x55b   :  { %v375_v63 = vpop.permute.xlu0 %374 }
 0x55c   :  { %v377_v1 = vmul.f32 %v375_v63, %v360_v55 }
 0x55e   :  { %v386_v2 = vmul.f32 %v3415_v0, %v377_v1 }
 0x560   :  { %388 = vrot.lane.b32.xlu0 %v386_v2, %s3231_s10 }
 0x5d2   :  { %v389_v5 = vpop.permute.xlu0 %388 }
 0x5d3   :  { %v392_v9 = vsel %vm391_vm3, %v389_v5, 0.0 }
 0x5d4   :  { %393 = vadd.xlane.f32.xlu1 %v392_v9 }
 0x661   :  { %v394_v10 = vpop.xlane.xlu1 %393 }
 0x662   :  { %v395_v11 = vrot.slane %v394_v10, 4 }
 0x664   :  { %v396_v12 = vadd.f32 %v395_v11, %v394_v10 }
 0x666   :  { %v397_v13 = vrot.slane %v396_v12, 2 }
 0x668   :  { %v398_v14 = vadd.f32 %v397_v13, %v396_v12 }
 0x66a   :  { %v399_v15 = vrot.slane %v398_v14, 1 }
 0x66c   :  { %v400_v16 = vadd.f32 %v399_v15, %v398_v14 }
 0x66e   :  { %3029 = vpush %v400_v16 }
 0x69f   :  { %s3030_s15 = spop %3029 }
 0x6a0   :  { %s3423_s18 = sadd.f32 %s3030_s15, %s3820_s8 }
 0x6a2   :  { %s3825_s14 = smov (!%p407_p11, %s2467_s14), %s3423_s18  ;;  %v404_v14 = vstv %s3423_s18 }
 0x6a3   :  { %v411_v19 = vstv %s3825_s14  ;;  %v405_v15 = vsel %vm403_vm4, %v404_v14, 0.0  ;;  %s2482_s14 = sld [smem:[#allocation3 + $0x4]] }
 0x6a4   :  { %v412_v20 = vmul.f32 %v411_v19, %v3342_v8  ;;  %v701_v19 = vld [vmem:[%s3814_s2 + $0x2] sm:$0x1] }
 0x6a6   :  { %v413_v21 = vadd.f32 %v412_v20, %v410_v18 }
 0x6a8   :  { %v484_v22 = vadd.f32 %v480_v47, %v413_v21 }
 0x6aa   :  { %3065 = vtanh.f32 %v484_v22 }
 0x6b4   :  { %v3066_v23 = vpop.eup %3065 }
 0x6b5   :  { %v486_v24 = vmul.f32 0.5, %v3066_v23 }
 0x6b7   :  { %v487_v25 = vadd.f32 0.5, %v486_v24 }
 0x6b9   :  { %v488_v27 = vsel %vm87_vm1, %v487_v25, %v3066_v23 }
 0x6ba   :  { %491 = vrot.lane.b32.xlu0 %v488_v27, %s3230_s30  ;;  %v489_v31 = vmul.f32 %v488_v27, %v3355_v26 }
 0x72c   :  { %v492_v28 = vpop.permute.xlu0 %491 }
 0x72d   :  { %v494_v29 = vmul.f32 %v492_v28, %v488_v27 }
 0x72f   :  { %496 = vrot.lane.b32.xlu0 %v494_v29, %s3230_s30 }
 0x7a1   :  { %v497_v32 = vpop.permute.xlu0 %496 }
 0x7a2   :  { %v3435_v33 = vadd.f32 %v497_v32, %v489_v31 }
 0x7a4   :  { %3067 = vtanh.f32 %v3435_v33 }
 0x7ae   :  { %v3068_v35 = vpop.eup %3067 }
 0x7af   :  { %502 = vrot.lane.b32.xlu0 %v3068_v35, %s3230_s30 }
 0x7b3   :  { %507 = vrot.lane.b32.xlu0 %v377_v1, %s3231_s10 }
 0x821   :  { %v503_v36 = vpop.permute.xlu0 %502 }
 0x822   :  { %v505_v39 = vmul.f32 %v503_v36, %v488_v27 }
 0x824   :  { %582 = vrot.lane.b32.xlu0 %v505_v39, %s3231_s10 }
 0x825   :  { %v508_v40 = vpop.permute.xlu0 %507 }
 0x826   :  { %2674 = vmatmul.mubr.msk.f32.vlgmr.msra.gmra.mrb[4].mxu0 %vm115_vm2, %v508_v40 }
 0x827   :  { %2923 = vmatpush3.bf16.msra.mxu0 %v3323_v4  ;;  %2695 = vmatprep.mubr.msk.f32.mxu0 %vm3228_vm0, %v3229_v6 }
 0x828   :  { %2924 = vmatprep.subr.bf16.mxu0 %v3227_v3 }
 0x82b   :  { %2926 = vmatpush3.bf16.msra.mxu0 %v3331_v7 }
 0x82c   :  { %2933 = vmatprep.subr.bf16.mxu0 %v3227_v3 }
 0x896   :  { %v583_v26 = vpop.permute.xlu0 %582 }
 0x897   :  { %2685 = vmatmul.mubr.msk.f32.vlgmr.msra.gmra.mrb[4].mxu1 %vm115_vm2, %v583_v26  ;;  %2696 = vmatmul.mubr.msk.f32.vlgmr.msra.gmra.mrb[6].mxu0 %vm115_vm2, %v583_v26 }
 0x898   :  { %2929 = vmatpush3.bf16.msra.mxu1 %v3358_v30  ;;  %2706 = vmatprep.mubr.msk.f32.mxu1 %vm3228_vm0, %v3229_v6 }
 0x899   :  { %2930 = vmatprep.subr.bf16.mxu1 %v3227_v3  ;;  %2935 = vmatpush3.bf16.msra.mxu0 %v3360_v34 }
 0x89a   :  { %2936 = vmatprep.subr.bf16.mxu0 %v3227_v3  ;;  %2717 = vmatprep.mubr.msk.f32.mxu0 %vm3228_vm0, %v3229_v6 }
 0x89c   :  { %2932 = vmatpush3.bf16.msra.mxu1 %v3363_v37 }
 0x89d   :  { %2939 = vmatprep.subr.bf16.mxu1 %v3227_v3  ;;  %2938 = vmatpush3.bf16.msra.mxu0 %v3367_v38 }
 0x89e   :  { %2945 = vmatprep.subr.bf16.mxu0 %v3227_v3 }
 0x8f9   :  { %v577_v41 = vpop.f32.mrb[4].mxu0 }
 0x8fa   :  { %v2675_v42 = vpop.f32.mrb[5].mxu0 }
 0x96a   :  { %v652_v43 = vpop.f32.mrb[4].mxu1  ;;  %v771_v44 = vpop.f32.mrb[6].mxu0 }
 0x96b   :  { %v653_v46 = vadd.f32 %v652_v43, %v577_v41  ;;  %v2686_v47 = vpop.f32.mrb[5].mxu1  ;;  %v2697_v48 = vpop.f32.mrb[7].mxu0 }
 0x96d   :  { %v656_v49 = vadd.f32 %v3400_v45, %v653_v46 }
 0x96f   :  { %3069 = vtanh.f32 %v656_v49 }
 0x979   :  { %v3070_v50 = vpop.eup %3069 }
 0x97a   :  { %v658_v51 = vmul.f32 0.5, %v3070_v50 }
 0x97c   :  { %v659_v52 = vadd.f32 0.5, %v658_v51 }
 0x97e   :  { %v660_v53 = vsel %vm87_vm1, %v659_v52, %v3070_v50 }
 0x97f   :  { %663 = vrot.lane.b32.xlu0 %v660_v53, %s3230_s30  ;;  %v661_v56 = vmul.f32 %v660_v53, %v3411_v61 }
 0x9f1   :  { %v664_v54 = vpop.permute.xlu0 %663 }
 0x9f2   :  { %v666_v55 = vmul.f32 %v664_v54, %v660_v53 }
 0x9f4   :  { %668 = vrot.lane.b32.xlu0 %v666_v55, %s3230_s30 }
 0xa66   :  { %v669_v57 = vpop.permute.xlu0 %668 }
 0xa67   :  { %v3468_v58 = vadd.f32 %v669_v57, %v661_v56 }
 0xa69   :  { %3071 = vtanh.f32 %v3468_v58 }
 0xa73   :  { %v3072_v59 = vpop.eup %3071 }
 0xa74   :  { %674 = vrot.lane.b32.xlu0 %v3072_v59, %s3230_s30 }
 0xae6   :  { %v675_v60 = vpop.permute.xlu0 %674 }
 0xae7   :  { %v677_v62 = vmul.f32 %v675_v60, %v660_v53 }
 0xae9   :  { %v678_v63 = vmul.f32 %v677_v62, %v3415_v0 }
 0xaeb   :  { %680 = vrot.lane.b32.xlu0 %v678_v63, %s3231_s10 }
 0xb5d   :  { %v681_v1 = vpop.permute.xlu0 %680 }
 0xb5e   :  { %v683_v2 = vsel %vm391_vm3, %v681_v1, 0.0 }
 0xb5f   :  { %684 = vadd.xlane.f32.xlu1 %v683_v2 }
 0xbec   :  { %v685_v61 = vpop.xlane.xlu1 %684 }
 0xbed   :  { %v686_v5 = vrot.slane %v685_v61, 4 }
 0xbef   :  { %v687_v9 = vadd.f32 %v686_v5, %v685_v61 }
 0xbf1   :  { %v688_v10 = vrot.slane %v687_v9, 2 }
 0xbf3   :  { %v689_v11 = vadd.f32 %v688_v10, %v687_v9 }
 0xbf5   :  { %v690_v12 = vrot.slane %v689_v11, 1 }
 0xbf7   :  { %v691_v13 = vadd.f32 %v690_v12, %v689_v11 }
 0xbf9   :  { %3031 = vpush %v691_v13 }
 0xc2a   :  { %s3032_s22 = spop %3031 }
 0xc2b   :  { %s693_s24 = sadd.f32 %s3032_s22, %s3820_s8 }
 0xc2d   :  { %v695_v16 = vstv %s693_s24  ;;  %s3827_s21 = smov (!%p698_p12, %s2472_s21), %s693_s24 }
 0xc2e   :  { %v3481_v18 = vsel %vm694_vm5, %v695_v16, %v405_v15  ;;  %v702_v20 = vstv %s3827_s21  ;;  %s2487_s21 = sld [smem:[#allocation3 + $0x5]] }
 0xc2f   :  { %v703_v21 = vmul.f32 %v702_v20, %v3342_v8 }
 0xc31   :  { %v704_v22 = vadd.f32 %v703_v21, %v701_v19  ;;  %v992_v19 = vld [vmem:[%s3814_s2 + $0x3] sm:$0x1] }
 0xc33   :  { %v775_v23 = vadd.f32 %v771_v44, %v704_v22 }
 0xc35   :  { %3073 = vtanh.f32 %v775_v23 }
 0xc3f   :  { %v3074_v24 = vpop.eup %3073 }
 0xc40   :  { %v777_v25 = vmul.f32 0.5, %v3074_v24 }
 0xc42   :  { %v778_v27 = vadd.f32 0.5, %v777_v25 }
 0xc44   :  { %v779_v28 = vsel %vm87_vm1, %v778_v27, %v3074_v24 }
 0xc45   :  { %782 = vrot.lane.b32.xlu0 %v779_v28, %s3230_s30  ;;  %v780_v32 = vmul.f32 %v779_v28, %v3435_v33 }
 0xcb7   :  { %v783_v29 = vpop.permute.xlu0 %782 }
 0xcb8   :  { %v785_v31 = vmul.f32 %v783_v29, %v779_v28 }
 0xcba   :  { %787 = vrot.lane.b32.xlu1 %v785_v31, %s3230_s30 }
 0xd2c   :  { %v788_v35 = vpop.permute.xlu1 %787 }
 0xd2d   :  { %v3492_v36 = vadd.f32 %v788_v35, %v780_v32 }
 0xd2f   :  { %3075 = vtanh.f32 %v3492_v36 }
 0xd39   :  { %v3076_v39 = vpop.eup %3075 }
 0xd3a   :  { %793 = vrot.lane.b32.xlu0 %v3076_v39, %s3230_s30 }
 0xd3e   :  { %798 = vrot.lane.b32.xlu0 %v677_v62, %s3231_s10 }
 0xdac   :  { %v794_v40 = vpop.permute.xlu0 %793 }
 0xdad   :  { %v796_v26 = vmul.f32 %v794_v40, %v779_v28 }
 0xdaf   :  { %873 = vrot.lane.b32.xlu0 %v796_v26, %s3231_s10 }
 0xdb0   :  { %v799_v41 = vpop.permute.xlu0 %798 }
 0xdb1   :  { %2707 = vmatmul.mubr.msk.f32.vlgmr.msra.gmra.mrb[6].mxu1 %vm115_vm2, %v799_v41 }
 0xdb2   :  { %2941 = vmatpush3.bf16.msra.mxu1 %v3323_v4  ;;  %2728 = vmatprep.mubr.msk.f32.mxu1 %vm3228_vm0, %v3229_v6 }
 0xdb3   :  { %2942 = vmatprep.subr.bf16.mxu1 %v3227_v3 }
 0xdb6   :  { %2944 = vmatpush3.bf16.msra.mxu1 %v3331_v7 }
 0xdb7   :  { %2951 = vmatprep.subr.bf16.mxu1 %v3227_v3 }
 0xe21   :  { %v874_v33 = vpop.permute.xlu0 %873 }
 0xe22   :  { %2718 = vmatmul.mubr.msk.f32.vlgmr.msra.gmra.mrb[8].mxu0 %vm115_vm2, %v874_v33  ;;  %2729 = vmatmul.mubr.msk.f32.vlgmr.msra.gmra.mrb[8].mxu1 %vm115_vm2, %v874_v33 }
 0xe23   :  { %2947 = vmatpush3.bf16.msra.mxu0 %v3358_v30  ;;  %2739 = vmatprep.mubr.msk.f32.mxu0 %vm3228_vm0, %v3229_v6 }
 0xe24   :  { %2948 = vmatprep.subr.bf16.mxu0 %v3227_v3  ;;  %2953 = vmatpush3.bf16.msra.mxu1 %v3360_v34 }
 0xe25   :  { %2954 = vmatprep.subr.bf16.mxu1 %v3227_v3  ;;  %2750 = vmatprep.mubr.msk.f32.mxu1 %vm3228_vm0, %v3229_v6 }
 0xe27   :  { %2950 = vmatpush3.bf16.msra.mxu0 %v3363_v37 }
 0xe28   :  { %2957 = vmatprep.subr.bf16.mxu0 %v3227_v3  ;;  %2956 = vmatpush3.bf16.msra.mxu1 %v3367_v38 }
 0xe29   :  { %2963 = vmatprep.subr.bf16.mxu1 %v3227_v3 }
 0xe84   :  { %v868_v42 = vpop.f32.mrb[6].mxu1 }
 0xe85   :  { %v2708_v43 = vpop.f32.mrb[7].mxu1 }
 0xef5   :  { %v943_v44 = vpop.f32.mrb[8].mxu0  ;;  %v1062_v46 = vpop.f32.mrb[8].mxu1 }
 0xef6   :  { %v944_v47 = vadd.f32 %v943_v44, %v868_v42  ;;  %v2719_v48 = vpop.f32.mrb[9].mxu0  ;;  %v2730_v49 = vpop.f32.mrb[9].mxu1 }
 0xef8   :  { %v947_v50 = vadd.f32 %v3400_v45, %v944_v47 }
 0xefa   :  { %3077 = vtanh.f32 %v947_v50 }
 0xf04   :  { %v3078_v51 = vpop.eup %3077 }
 0xf05   :  { %v949_v52 = vmul.f32 0.5, %v3078_v51 }
 0xf07   :  { %v950_v53 = vadd.f32 0.5, %v949_v52 }
 0xf09   :  { %v951_v54 = vsel %vm87_vm1, %v950_v53, %v3078_v51 }
 0xf0a   :  { %954 = vrot.lane.b32.xlu0 %v951_v54, %s3230_s30  ;;  %v952_v57 = vmul.f32 %v951_v54, %v3468_v58 }
 0xf7c   :  { %v955_v55 = vpop.permute.xlu0 %954 }
 0xf7d   :  { %v957_v56 = vmul.f32 %v955_v55, %v951_v54 }
 0xf7f   :  { %959 = vrot.lane.b32.xlu1 %v957_v56, %s3230_s30 }
 0xff1   :  { %v960_v59 = vpop.permute.xlu1 %959 }
 0xff2   :  { %v3525_v60 = vadd.f32 %v960_v59, %v952_v57 }
 0xff4   :  { %3079 = vtanh.f32 %v3525_v60 }
 0xffe   :  { %v3080_v62 = vpop.eup %3079 }
 0xfff   :  { %965 = vrot.lane.b32.xlu0 %v3080_v62, %s3230_s30 }
0x1071   :  { %v966_v63 = vpop.permute.xlu0 %965 }
0x1072   :  { %v968_v1 = vmul.f32 %v966_v63, %v951_v54 }
0x1074   :  { %v969_v2 = vmul.f32 %v968_v1, %v3415_v0 }
0x1076   :  { %971 = vrot.lane.b32.xlu1 %v969_v2, %s3231_s10 }
0x10e8   :  { %v972_v61 = vpop.permute.xlu1 %971 }
0x10e9   :  { %v974_v5 = vsel %vm391_vm3, %v972_v61, 0.0 }
0x10ea   :  { %975 = vadd.xlane.f32.xlu0 %v974_v5 }
0x1177   :  { %v976_v9 = vpop.xlane.xlu0 %975 }
0x1178   :  { %v977_v58 = vrot.slane %v976_v9, 4 }
0x117a   :  { %v978_v10 = vadd.f32 %v977_v58, %v976_v9 }
0x117c   :  { %v979_v11 = vrot.slane %v978_v10, 2 }
0x117e   :  { %v980_v12 = vadd.f32 %v979_v11, %v978_v10 }
0x1180   :  { %v981_v13 = vrot.slane %v980_v12, 1 }
0x1182   :  { %v982_v14 = vadd.f32 %v981_v13, %v980_v12 }
0x1184   :  { %3033 = vpush %v982_v14 }
0x11b5   :  { %s3034_s28 = spop %3033 }
0x11b6   :  { %s984_s1 = sadd.f32 %s3034_s28, %s3820_s8 }
0x11b8   :  { %v986_v15 = vstv %s984_s1  ;;  %s3829_s27 = smov (!%p989_p13, %s2477_s27), %s984_s1 }
0x11b9   :  { %v3537_v16 = vsel %vm985_vm6, %v986_v15, %v3481_v18  ;;  %v993_v20 = vstv %s3829_s27  ;;  %s2492_s27 = sld [smem:[#allocation3 + $0x6]] }
0x11ba   :  { %v994_v21 = vmul.f32 %v993_v20, %v3342_v8 }
0x11bc   :  { %v995_v22 = vadd.f32 %v994_v21, %v992_v19  ;;  %v1283_v19 = vld [vmem:[%s3814_s2 + $0x4] sm:$0x1] }
0x11be   :  { %v1066_v23 = vadd.f32 %v1062_v46, %v995_v22 }
0x11c0   :  { %3081 = vtanh.f32 %v1066_v23 }
0x11ca   :  { %v3082_v24 = vpop.eup %3081 }
0x11cb   :  { %v1068_v25 = vmul.f32 0.5, %v3082_v24 }
0x11cd   :  { %v1069_v27 = vadd.f32 0.5, %v1068_v25 }
0x11cf   :  { %v1070_v28 = vsel %vm87_vm1, %v1069_v27, %v3082_v24 }
0x11d0   :  { %1073 = vrot.lane.b32.xlu1 %v1070_v28, %s3230_s30  ;;  %v1071_v31 = vmul.f32 %v1070_v28, %v3492_v36 }
0x1242   :  { %v1074_v18 = vpop.permute.xlu1 %1073 }
0x1243   :  { %v1076_v29 = vmul.f32 %v1074_v18, %v1070_v28 }
0x1245   :  { %1078 = vrot.lane.b32.xlu1 %v1076_v29, %s3230_s30 }
0x12b7   :  { %v1079_v32 = vpop.permute.xlu1 %1078 }
0x12b8   :  { %v3548_v35 = vadd.f32 %v1079_v32, %v1071_v31 }
0x12ba   :  { %3083 = vtanh.f32 %v3548_v35 }
0x12c4   :  { %v3084_v39 = vpop.eup %3083 }
0x12c5   :  { %1084 = vrot.lane.b32.xlu1 %v3084_v39, %s3230_s30 }
0x12c9   :  { %1089 = vrot.lane.b32.xlu1 %v968_v1, %s3231_s10 }
0x1337   :  { %v1085_v40 = vpop.permute.xlu1 %1084 }
0x1338   :  { %v1087_v26 = vmul.f32 %v1085_v40, %v1070_v28 }
0x133a   :  { %1164 = vrot.lane.b32.xlu1 %v1087_v26, %s3231_s10 }
0x133b   :  { %v1090_v41 = vpop.permute.xlu1 %1089 }
0x133c   :  { %2740 = vmatmul.mubr.msk.f32.vlgmr.msra.gmra.mrb[10].mxu0 %vm115_vm2, %v1090_v41 }
0x133d   :  { %2959 = vmatpush3.bf16.msra.mxu0 %v3323_v4  ;;  %2761 = vmatprep.mubr.msk.f32.mxu0 %vm3228_vm0, %v3229_v6 }
0x133e   :  { %2960 = vmatprep.subr.bf16.mxu0 %v3227_v3 }
0x1341   :  { %2962 = vmatpush3.bf16.msra.mxu0 %v3331_v7 }
0x1342   :  { %2969 = vmatprep.subr.bf16.mxu0 %v3227_v3 }
0x13ac   :  { %v1165_v36 = vpop.permute.xlu1 %1164 }
0x13ad   :  { %2751 = vmatmul.mubr.msk.f32.vlgmr.msra.gmra.mrb[10].mxu1 %vm115_vm2, %v1165_v36  ;;  %2762 = vmatmul.mubr.msk.f32.vlgmr.msra.gmra.mrb[12].mxu0 %vm115_vm2, %v1165_v36 }
0x13ae   :  { %2965 = vmatpush3.bf16.msra.mxu1 %v3358_v30  ;;  %2772 = vmatprep.mubr.msk.f32.mxu1 %vm3228_vm0, %v3229_v6 }
0x13af   :  { %2966 = vmatprep.subr.bf16.mxu1 %v3227_v3  ;;  %2971 = vmatpush3.bf16.msra.mxu0 %v3360_v34 }
0x13b0   :  { %2972 = vmatprep.subr.bf16.mxu0 %v3227_v3  ;;  %2783 = vmatprep.mubr.msk.f32.mxu0 %vm3228_vm0, %v3229_v6 }
0x13b2   :  { %2968 = vmatpush3.bf16.msra.mxu1 %v3363_v37 }
0x13b3   :  { %2975 = vmatprep.subr.bf16.mxu1 %v3227_v3  ;;  %2974 = vmatpush3.bf16.msra.mxu0 %v3367_v38 }
0x13b4   :  { %2981 = vmatprep.subr.bf16.mxu0 %v3227_v3 }
0x140f   :  { %v1159_v33 = vpop.f32.mrb[10].mxu0 }
0x1410   :  { %v2741_v42 = vpop.f32.mrb[11].mxu0 }
0x1480   :  { %v1234_v43 = vpop.f32.mrb[10].mxu1  ;;  %v1353_v44 = vpop.f32.mrb[12].mxu0 }
0x1481   :  { %v1235_v46 = vadd.f32 %v1234_v43, %v1159_v33  ;;  %v2752_v47 = vpop.f32.mrb[11].mxu1  ;;  %v2763_v48 = vpop.f32.mrb[13].mxu0 }
0x1483   :  { %v1238_v49 = vadd.f32 %v3400_v45, %v1235_v46 }
0x1485   :  { %3085 = vtanh.f32 %v1238_v49 }
0x148f   :  { %v3086_v50 = vpop.eup %3085 }
0x1490   :  { %v1240_v51 = vmul.f32 0.5, %v3086_v50 }
0x1492   :  { %v1241_v52 = vadd.f32 0.5, %v1240_v51 }
0x1494   :  { %v1242_v53 = vsel %vm87_vm1, %v1241_v52, %v3086_v50 }
0x1495   :  { %1245 = vrot.lane.b32.xlu1 %v1242_v53, %s3230_s30  ;;  %v1243_v56 = vmul.f32 %v1242_v53, %v3525_v60 }
0x1507   :  { %v1246_v54 = vpop.permute.xlu1 %1245 }
0x1508   :  { %v1248_v55 = vmul.f32 %v1246_v54, %v1242_v53 }
0x150a   :  { %1250 = vrot.lane.b32.xlu1 %v1248_v55, %s3230_s30 }
0x157c   :  { %v1251_v57 = vpop.permute.xlu1 %1250 }
0x157d   :  { %v3581_v59 = vadd.f32 %v1251_v57, %v1243_v56 }
0x157f   :  { %3087 = vtanh.f32 %v3581_v59 }
0x1589   :  { %v3088_v62 = vpop.eup %3087 }
0x158a   :  { %1256 = vrot.lane.b32.xlu1 %v3088_v62, %s3230_s30 }
0x15fc   :  { %v1257_v63 = vpop.permute.xlu1 %1256 }
0x15fd   :  { %v1259_v1 = vmul.f32 %v1257_v63, %v1242_v53 }
0x15ff   :  { %v1260_v2 = vmul.f32 %v1259_v1, %v3415_v0 }
0x1601   :  { %1262 = vrot.lane.b32.xlu0 %v1260_v2, %s3231_s10 }
0x1673   :  { %v1263_v61 = vpop.permute.xlu0 %1262 }
0x1674   :  { %v1265_v5 = vsel %vm391_vm3, %v1263_v61, 0.0 }
0x1675   :  { %1266 = vadd.xlane.f32.xlu1 %v1265_v5 }
0x1702   :  { %v1267_v9 = vpop.xlane.xlu1 %1266 }
0x1703   :  { %v1268_v60 = vrot.slane %v1267_v9, 4 }
0x1705   :  { %v1269_v58 = vadd.f32 %v1268_v60, %v1267_v9 }
0x1707   :  { %v1270_v10 = vrot.slane %v1269_v58, 2 }
0x1709   :  { %v1271_v11 = vadd.f32 %v1270_v10, %v1269_v58 }
0x170b   :  { %v1272_v12 = vrot.slane %v1271_v11, 1 }
0x170d   :  { %v1273_v13 = vadd.f32 %v1272_v12, %v1271_v11 }
0x170f   :  { %3035 = vpush %v1273_v13 }
0x1740   :  { %s3036_s15 = spop %3035 }
0x1741   :  { %s1275_s18 = sadd.f32 %s3036_s15, %s3820_s8 }
0x1743   :  { %v1277_v14 = vstv %s1275_s18  ;;  %s3831_s14 = smov (!%p1280_p0, %s2482_s14), %s1275_s18 }
0x1744   :  { %v3593_v15 = vsel %vm1276_vm7, %v1277_v14, %v3537_v16  ;;  %v1284_v20 = vstv %s3831_s14 }
0x1745   :  { %v1285_v21 = vmul.f32 %v1284_v20, %v3342_v8 }
0x1747   :  { %v1286_v22 = vadd.f32 %v1285_v21, %v1283_v19  ;;  %v1574_v19 = vld [vmem:[%s3814_s2 + $0x5] sm:$0x1] }
0x1749   :  { %v1357_v23 = vadd.f32 %v1353_v44, %v1286_v22 }
0x174b   :  { %3089 = vtanh.f32 %v1357_v23 }
0x1755   :  { %v3090_v24 = vpop.eup %3089 }
0x1756   :  { %v1359_v25 = vmul.f32 0.5, %v3090_v24 }
0x1758   :  { %v1360_v27 = vadd.f32 0.5, %v1359_v25 }
0x175a   :  { %v1361_v28 = vsel %vm87_vm1, %v1360_v27, %v3090_v24 }
0x175b   :  { %1364 = vrot.lane.b32.xlu0 %v1361_v28, %s3230_s30  ;;  %v1362_v29 = vmul.f32 %v1361_v28, %v3548_v35 }
0x17cd   :  { %v1365_v16 = vpop.permute.xlu0 %1364 }
0x17ce   :  { %v1367_v18 = vmul.f32 %v1365_v16, %v1361_v28 }
0x17d0   :  { %1369 = vrot.lane.b32.xlu0 %v1367_v18, %s3230_s30 }
0x1842   :  { %v1370_v31 = vpop.permute.xlu0 %1369 }
0x1843   :  { %v3604_v32 = vadd.f32 %v1370_v31, %v1362_v29 }
0x1845   :  { %3091 = vtanh.f32 %v3604_v32 }
0x184f   :  { %v3092_v39 = vpop.eup %3091 }
0x1850   :  { %1375 = vrot.lane.b32.xlu0 %v3092_v39, %s3230_s30 }
0x1854   :  { %1380 = vrot.lane.b32.xlu0 %v1259_v1, %s3231_s10 }
0x18c2   :  { %v1376_v40 = vpop.permute.xlu0 %1375 }
0x18c3   :  { %v1378_v26 = vmul.f32 %v1376_v40, %v1361_v28 }
0x18c5   :  { %1455 = vrot.lane.b32.xlu0 %v1378_v26, %s3231_s10 }
0x18c6   :  { %v1381_v41 = vpop.permute.xlu0 %1380 }
0x18c7   :  { %2773 = vmatmul.mubr.msk.f32.vlgmr.msra.gmra.mrb[12].mxu1 %vm115_vm2, %v1381_v41 }
0x18c8   :  { %2977 = vmatpush3.bf16.msra.mxu1 %v3323_v4  ;;  %2794 = vmatprep.mubr.msk.f32.mxu1 %vm3228_vm0, %v3229_v6 }
0x18c9   :  { %2978 = vmatprep.subr.bf16.mxu1 %v3227_v3 }
0x18cc   :  { %2980 = vmatpush3.bf16.msra.mxu1 %v3331_v7 }
0x18cd   :  { %2987 = vmatprep.subr.bf16.mxu1 %v3227_v3 }
0x1937   :  { %v1456_v35 = vpop.permute.xlu0 %1455 }
0x1938   :  { %2784 = vmatmul.mubr.msk.f32.vlgmr.msra.gmra.mrb[14].mxu0 %vm115_vm2, %v1456_v35  ;;  %2795 = vmatmul.mubr.msk.f32.vlgmr.msra.gmra.mrb[14].mxu1 %vm115_vm2, %v1456_v35 }
0x1939   :  { %2983 = vmatpush3.bf16.msra.mxu0 %v3358_v30  ;;  %2805 = vmatprep.mubr.msk.f32.mxu0 %vm3228_vm0, %v3229_v6 }
0x193a   :  { %2984 = vmatprep.subr.bf16.mxu0 %v3227_v3  ;;  %2989 = vmatpush3.bf16.msra.mxu1 %v3360_v34 }
0x193b   :  { %2990 = vmatprep.subr.bf16.mxu1 %v3227_v3  ;;  %2816 = vmatprep.mubr.msk.f32.mxu1 %vm3228_vm0, %v3229_v6 }
0x193d   :  { %2986 = vmatpush3.bf16.msra.mxu0 %v3363_v37 }
0x193e   :  { %2993 = vmatprep.subr.bf16.mxu0 %v3227_v3  ;;  %2992 = vmatpush3.bf16.msra.mxu1 %v3367_v38 }
0x193f   :  { %2999 = vmatprep.subr.bf16.mxu1 %v3227_v3 }
0x199a   :  { %v1450_v36 = vpop.f32.mrb[12].mxu1 }
0x199b   :  { %v2774_v33 = vpop.f32.mrb[13].mxu1 }
0x1a0b   :  { %v1525_v42 = vpop.f32.mrb[14].mxu0  ;;  %v1644_v43 = vpop.f32.mrb[14].mxu1 }
0x1a0c   :  { %v1526_v44 = vadd.f32 %v1525_v42, %v1450_v36  ;;  %v2785_v46 = vpop.f32.mrb[15].mxu0  ;;  %v2796_v47 = vpop.f32.mrb[15].mxu1 }
0x1a0e   :  { %v1529_v48 = vadd.f32 %v3400_v45, %v1526_v44 }
0x1a10   :  { %3093 = vtanh.f32 %v1529_v48 }
0x1a1a   :  { %v3094_v49 = vpop.eup %3093 }
0x1a1b   :  { %v1531_v50 = vmul.f32 0.5, %v3094_v49 }
0x1a1d   :  { %v1532_v51 = vadd.f32 0.5, %v1531_v50 }
0x1a1f   :  { %v1533_v52 = vsel %vm87_vm1, %v1532_v51, %v3094_v49 }
0x1a20   :  { %1536 = vrot.lane.b32.xlu1 %v1533_v52, %s3230_s30  ;;  %v1534_v55 = vmul.f32 %v1533_v52, %v3581_v59 }
0x1a92   :  { %v1537_v53 = vpop.permute.xlu1 %1536 }
0x1a93   :  { %v1539_v54 = vmul.f32 %v1537_v53, %v1533_v52 }
0x1a95   :  { %1541 = vrot.lane.b32.xlu0 %v1539_v54, %s3230_s30 }
0x1b07   :  { %v1542_v56 = vpop.permute.xlu0 %1541 }
0x1b08   :  { %v3637_v57 = vadd.f32 %v1542_v56, %v1534_v55 }
0x1b0a   :  { %3095 = vtanh.f32 %v3637_v57 }
0x1b14   :  { %v3096_v62 = vpop.eup %3095 }
0x1b15   :  { %1547 = vrot.lane.b32.xlu0 %v3096_v62, %s3230_s30 }
0x1b87   :  { %v1548_v63 = vpop.permute.xlu0 %1547 }
0x1b88   :  { %v1550_v1 = vmul.f32 %v1548_v63, %v1533_v52 }
0x1b8a   :  { %v1551_v2 = vmul.f32 %v1550_v1, %v3415_v0 }
0x1b8c   :  { %1553 = vrot.lane.b32.xlu0 %v1551_v2, %s3231_s10 }
0x1bfe   :  { %v1554_v61 = vpop.permute.xlu0 %1553 }
0x1bff   :  { %v1556_v5 = vsel %vm391_vm3, %v1554_v61, 0.0 }
0x1c00   :  { %1557 = vadd.xlane.f32.xlu0 %v1556_v5 }
0x1c8d   :  { %v1558_v9 = vpop.xlane.xlu0 %1557 }
0x1c8e   :  { %v1559_v59 = vrot.slane %v1558_v9, 4 }
0x1c90   :  { %v1560_v60 = vadd.f32 %v1559_v59, %v1558_v9 }
0x1c92   :  { %v1561_v58 = vrot.slane %v1560_v60, 2 }
0x1c94   :  { %v1562_v10 = vadd.f32 %v1561_v58, %v1560_v60 }
0x1c96   :  { %v1563_v11 = vrot.slane %v1562_v10, 1 }
0x1c98   :  { %v1564_v12 = vadd.f32 %v1563_v11, %v1562_v10 }
0x1c9a   :  { %3037 = vpush %v1564_v12  ;;  %v1865_v12 = vld [vmem:[%s3814_s2 + $0x6] sm:$0x1] }
0x1ccb   :  { %s3038_s22 = spop %3037 }
0x1ccc   :  { %s1566_s24 = sadd.f32 %s3038_s22, %s3820_s8 }
0x1cce   :  { %v1568_v13 = vstv %s1566_s24  ;;  %s3833_s21 = smov (!%p1571_p1, %s2487_s21), %s1566_s24 }
0x1ccf   :  { %v3649_v14 = vsel %vm1567_vm8, %v1568_v13, %v3593_v15  ;;  %v1575_v20 = vstv %s3833_s21 }
0x1cd0   :  { %v1576_v21 = vmul.f32 %v1575_v20, %v3342_v8 }
0x1cd2   :  { %v1577_v22 = vadd.f32 %v1576_v21, %v1574_v19  ;;  %v3713_v19 = vld [vmem:[%s3815_s3] sm:$0x1] }
0x1cd4   :  { %v1648_v23 = vadd.f32 %v1644_v43, %v1577_v22 }
0x1cd6   :  { %3097 = vtanh.f32 %v1648_v23 }
0x1ce0   :  { %v3098_v24 = vpop.eup %3097 }
0x1ce1   :  { %v1650_v25 = vmul.f32 0.5, %v3098_v24 }
0x1ce3   :  { %v1651_v27 = vadd.f32 0.5, %v1650_v25 }
0x1ce5   :  { %v1652_v28 = vsel %vm87_vm1, %v1651_v27, %v3098_v24 }
0x1ce6   :  { %1655 = vrot.lane.b32.xlu1 %v1652_v28, %s3230_s30  ;;  %v1653_v18 = vmul.f32 %v1652_v28, %v3604_v32 }
0x1d58   :  { %v1656_v15 = vpop.permute.xlu1 %1655 }
0x1d59   :  { %v1658_v16 = vmul.f32 %v1656_v15, %v1652_v28 }
0x1d5b   :  { %1660 = vrot.lane.b32.xlu1 %v1658_v16, %s3230_s30 }
0x1dcd   :  { %v1661_v29 = vpop.permute.xlu1 %1660 }
0x1dce   :  { %v3660_v31 = vadd.f32 %v1661_v29, %v1653_v18 }
0x1dd0   :  { %3099 = vtanh.f32 %v3660_v31 }
0x1dda   :  { %v3100_v8 = vpop.eup %3099 }
0x1ddb   :  { %1666 = vrot.lane.b32.xlu1 %v3100_v8, %s3230_s30 }
0x1ddf   :  { %1671 = vrot.lane.b32.xlu1 %v1550_v1, %s3231_s10 }
0x1e4d   :  { %v1667_v39 = vpop.permute.xlu1 %1666 }
0x1e4e   :  { %v1669_v40 = vmul.f32 %v1667_v39, %v1652_v28 }
0x1e50   :  { %1746 = vrot.lane.b32.xlu1 %v1669_v40, %s3231_s10 }
0x1e51   :  { %v1672_v26 = vpop.permute.xlu1 %1671 }
0x1e52   :  { %2806 = vmatmul.mubr.msk.f32.vlgmr.msra.gmra.mrb[16].mxu0 %vm115_vm2, %v1672_v26 }
0x1e53   :  { %2995 = vmatpush3.bf16.msra.mxu0 %v3323_v4  ;;  %2827 = vmatprep.mubr.msk.f32.mxu0 %vm3228_vm0, %v3229_v6 }
0x1e54   :  { %2996 = vmatprep.subr.bf16.mxu0 %v3227_v3 }
0x1e57   :  { %2998 = vmatpush3.bf16.msra.mxu0 %v3331_v7 }
0x1e58   :  { %3005 = vmatprep.subr.bf16.mxu0 %v3227_v3 }
0x1ec2   :  { %v1747_v32 = vpop.permute.xlu1 %1746 }
0x1ec3   :  { %2817 = vmatmul.mubr.msk.f32.vlgmr.msra.gmra.mrb[16].mxu1 %vm115_vm2, %v1747_v32  ;;  %2828 = vmatmul.mubr.msk.f32.vlgmr.msra.gmra.mrb[18].mxu0 %vm115_vm2, %v1747_v32 }
0x1ec4   :  { %3001 = vmatpush3.bf16.msra.mxu1 %v3358_v30  ;;  %2838 = vmatprep.mubr.msk.f32.mxu1 %vm3228_vm0, %v3229_v6 }
0x1ec5   :  { %3002 = vmatprep.subr.bf16.mxu1 %v3227_v3  ;;  %3007 = vmatpush3.bf16.msra.mxu0 %v3360_v34 }
0x1ec6   :  { %3008 = vmatprep.subr.bf16.mxu0 %v3227_v3  ;;  %2849 = vmatprep.mubr.msk.f32.mxu0 %vm3228_vm0, %v3229_v6 }
0x1ec8   :  { %3004 = vmatpush3.bf16.msra.mxu1 %v3363_v37 }
0x1ec9   :  { %3011 = vmatprep.subr.bf16.mxu1 %v3227_v3  ;;  %3010 = vmatpush3.bf16.msra.mxu0 %v3367_v38 }
0x1eca   :  { %3017 = vmatprep.subr.bf16.mxu0 %v3227_v3 }
0x1f25   :  { %v1741_v41 = vpop.f32.mrb[16].mxu0 }
0x1f26   :  { %v2807_v35 = vpop.f32.mrb[17].mxu0 }
0x1f96   :  { %v1816_v36 = vpop.f32.mrb[16].mxu1  ;;  %v1935_v33 = vpop.f32.mrb[18].mxu0 }
0x1f97   :  { %v1817_v42 = vadd.f32 %v1816_v36, %v1741_v41  ;;  %v2818_v43 = vpop.f32.mrb[17].mxu1  ;;  %v2829_v44 = vpop.f32.mrb[19].mxu0 }
0x1f99   :  { %v1820_v46 = vadd.f32 %v3400_v45, %v1817_v42 }
0x1f9b   :  { %3101 = vtanh.f32 %v1820_v46 }
0x1fa5   :  { %v3102_v47 = vpop.eup %3101 }
0x1fa6   :  { %v1822_v48 = vmul.f32 0.5, %v3102_v47 }
0x1fa8   :  { %v1823_v49 = vadd.f32 0.5, %v1822_v48 }
0x1faa   :  { %v1824_v50 = vsel %vm87_vm1, %v1823_v49, %v3102_v47 }
0x1fab   :  { %1827 = vrot.lane.b32.xlu1 %v1824_v50, %s3230_s30  ;;  %v1825_v53 = vmul.f32 %v1824_v50, %v3637_v57 }
0x201d   :  { %v1828_v51 = vpop.permute.xlu1 %1827 }
0x201e   :  { %v1830_v52 = vmul.f32 %v1828_v51, %v1824_v50 }
0x2020   :  { %1832 = vrot.lane.b32.xlu1 %v1830_v52, %s3230_s30 }
0x2092   :  { %v1833_v54 = vpop.permute.xlu1 %1832 }
0x2093   :  { %v3693_v55 = vadd.f32 %v1833_v54, %v1825_v53 }
0x2095   :  { %3103 = vtanh.f32 %v3693_v55 }
0x209f   :  { %v3104_v45 = vpop.eup %3103 }
0x20a0   :  { %1838 = vrot.lane.b32.xlu1 %v3104_v45, %s3230_s30 }
0x2112   :  { %v1839_v56 = vpop.permute.xlu1 %1838 }
0x2113   :  { %v1841_v62 = vmul.f32 %v1839_v56, %v1824_v50 }
0x2115   :  { %v1842_v63 = vmul.f32 %v1841_v62, %v3415_v0 }
0x2117   :  { %1844 = vrot.lane.b32.xlu0 %v1842_v63, %s3231_s10 }
0x2189   :  { %v1845_v1 = vpop.permute.xlu0 %1844 }
0x218a   :  { %v1847_v2 = vsel %vm391_vm3, %v1845_v1, 0.0 }
0x218b   :  { %1848 = vadd.xlane.f32.xlu1 %v1847_v2 }
0x2218   :  { %v1849_v61 = vpop.xlane.xlu1 %1848 }
0x2219   :  { %v1850_v57 = vrot.slane %v1849_v61, 4 }
0x221b   :  { %v1851_v5 = vadd.f32 %v1850_v57, %v1849_v61  ;;  %v2156_v61 = vld [vmem:[%s3814_s2 + $0x7] sm:$0x1] }
0x221d   :  { %v1852_v9 = vrot.slane %v1851_v5, 2 }
0x221f   :  { %v1853_v59 = vadd.f32 %v1852_v9, %v1851_v5 }
0x2221   :  { %v1854_v60 = vrot.slane %v1853_v59, 1 }
0x2223   :  { %v1855_v58 = vadd.f32 %v1854_v60, %v1853_v59 }
0x2225   :  { %3039 = vpush %v1855_v58 }
0x2256   :  { %s3040_s28 = spop %3039 }
0x2257   :  { %s1857_s1 = sadd.f32 %s3040_s28, %s3820_s8 }
0x2259   :  { %v1859_v10 = vstv %s1857_s1  ;;  %s3835_s27 = smov (!%p1862_p2, %s2492_s27), %s1857_s1 }
0x225a   :  { %v3705_v11 = vsel %vm1858_vm9, %v1859_v10, %v3649_v14  ;;  %v1866_v13 = vstv %s3835_s27 }
0x225b   :  { %v1867_v20 = vmul.f32 %v3713_v19, %v1866_v13 }
0x225d   :  { %v1868_v21 = vadd.f32 %v1867_v20, %v1865_v12 }
0x225f   :  { %v1939_v22 = vadd.f32 %v1935_v33, %v1868_v21 }
0x2261   :  { %3105 = vtanh.f32 %v1939_v22 }
0x226b   :  { %v3106_v23 = vpop.eup %3105 }
0x226c   :  { %v1941_v24 = vmul.f32 0.5, %v3106_v23 }
0x226e   :  { %v1942_v25 = vadd.f32 0.5, %v1941_v24 }
0x2270   :  { %v1943_v14 = vsel %vm87_vm1, %v1942_v25, %v3106_v23 }
0x2271   :  { %1946 = vrot.lane.b32.xlu0 %v1943_v14, %s3230_s30  ;;  %v1944_v15 = vmul.f32 %v1943_v14, %v3660_v31 }
0x22e3   :  { %v1947_v27 = vpop.permute.xlu0 %1946 }
0x22e4   :  { %v1949_v28 = vmul.f32 %v1947_v27, %v1943_v14 }
0x22e6   :  { %1951 = vrot.lane.b32.xlu0 %v1949_v28, %s3230_s30 }
0x2358   :  { %v1952_v16 = vpop.permute.xlu0 %1951 }
0x2359   :  { %v3721_v18 = vadd.f32 %v1952_v16, %v1944_v15 }
0x235b   :  { %3107 = vtanh.f32 %v3721_v18 }
0x2365   :  { %v3108_v29 = vpop.eup %3107 }
0x2366   :  { %1957 = vrot.lane.b32.xlu0 %v3108_v29, %s3230_s30 }
0x236a   :  { %1962 = vrot.lane.b32.xlu0 %v1841_v62, %s3231_s10 }
0x23d8   :  { %v1958_v8 = vpop.permute.xlu0 %1957 }
0x23d9   :  { %v1960_v39 = vmul.f32 %v1958_v8, %v1943_v14 }
0x23db   :  { %2037 = vrot.lane.b32.xlu0 %v1960_v39, %s3231_s10 }
0x23dc   :  { %v1963_v40 = vpop.permute.xlu0 %1962 }
0x23dd   :  { %2839 = vmatmul.mubr.msk.f32.vlgmr.msra.gmra.mrb[18].mxu1 %vm115_vm2, %v1963_v40 }
0x23de   :  { %3013 = vmatpush3.bf16.msra.mxu1 %v3323_v4  ;;  %2860 = vmatprep.mubr.msk.f32.mxu1 %vm3228_vm0, %v3229_v6 }
0x23df   :  { %3014 = vmatprep.subr.bf16.mxu1 %v3227_v3 }
0x23e2   :  { %3016 = vmatpush3.bf16.msra.mxu1 %v3331_v7 }
0x23e3   :  { %3023 = vmatprep.subr.bf16.mxu1 %v3227_v3 }
0x244d   :  { %v2038_v31 = vpop.permute.xlu0 %2037 }
0x244e   :  { %2850 = vmatmul.mubr.msk.f32.vlgmr.msra.gmra.mrb[20].mxu0 %vm115_vm2, %v2038_v31  ;;  %2861 = vmatmul.mubr.msk.f32.vlgmr.msra.gmra.mrb[20].mxu1 %vm115_vm2, %v2038_v31 }
0x244f   :  { %3019 = vmatpush3.bf16.msra.mxu0 %v3358_v30  ;;  %2871 = vmatprep.mubr.msk.f32.mxu0 %vm3228_vm0, %v3229_v6 }
0x2450   :  { %3020 = vmatprep.subr.bf16.mxu0 %v3227_v3  ;;  %3025 = vmatpush3.bf16.msra.mxu1 %v3360_v34  ;;  %v3749_v34 = vld [vmem:[%s3818_s6 + $0x1] sm:$0x1]  ;;  %s2496_s6 = sld [smem:[#allocation8 + $0x7]] }
0x2451   :  { %3026 = vmatprep.subr.bf16.mxu1 %v3227_v3  ;;  %2882 = vmatprep.mubr.msk.f32.mxu1 %vm3228_vm0, %v3229_v6 }
0x2453   :  { %3022 = vmatpush3.bf16.msra.mxu0 %v3363_v37 }
0x2454   :  { %3028 = vmatpush3.bf16.msra.mxu1 %v3367_v38 }
0x2456   :  { %p2153_p3 = scmp.ne.s32.totalorder %s2496_s6, 0 }
0x24b0   :  { %v2032_v4 = vpop.f32.mrb[18].mxu1 }
0x24b1   :  { %v2840_v7 = vpop.f32.mrb[19].mxu1 }
0x2521   :  { %v2107_v26 = vpop.f32.mrb[20].mxu0  ;;  %v2226_v30 = vpop.f32.mrb[20].mxu1 }
0x2522   :  { %v2108_v32 = vadd.f32 %v2107_v26, %v2032_v4  ;;  %v2851_v41 = vpop.f32.mrb[21].mxu0  ;;  %v2862_v35 = vpop.f32.mrb[21].mxu1 }
0x2524   :  { %v2111_v3 = vadd.f32 %v3749_v34, %v2108_v32 }
0x2526   :  { %3109 = vtanh.f32 %v2111_v3 }
0x2530   :  { %v3110_v6 = vpop.eup %3109 }
0x2531   :  { %v2113_v36 = vmul.f32 0.5, %v3110_v6 }
0x2533   :  { %v2114_v37 = vadd.f32 0.5, %v2113_v36 }
0x2535   :  { %v2115_v38 = vsel %vm87_vm1, %v2114_v37, %v3110_v6 }
0x2536   :  { %2118 = vrot.lane.b32.xlu1 %v2115_v38, %s3230_s30  ;;  %v2116_v43 = vmul.f32 %v2115_v38, %v3693_v55 }
0x25a8   :  { %v2119_v33 = vpop.permute.xlu1 %2118 }
0x25a9   :  { %v2121_v42 = vmul.f32 %v2119_v33, %v2115_v38 }
0x25ab   :  { %2123 = vrot.lane.b32.xlu0 %v2121_v42, %s3230_s30 }
0x261d   :  { %v2124_v44 = vpop.permute.xlu0 %2123 }
0x261e   :  { %v3757_v46 = vadd.f32 %v2124_v44, %v2116_v43 }
0x2620   :  { %3111 = vtanh.f32 %v3757_v46 }
0x262a   :  { %v3112_v47 = vpop.eup %3111 }
0x262b   :  { %2129 = vrot.lane.b32.xlu0 %v3112_v47, %s3230_s30 }
0x269d   :  { %v2130_v48 = vpop.permute.xlu0 %2129 }
0x269e   :  { %v2132_v49 = vmul.f32 %v2130_v48, %v2115_v38 }
0x26a0   :  { %v2133_v50 = vmul.f32 %v2132_v49, %v3415_v0 }
0x26a2   :  { %2135 = vrot.lane.b32.xlu0 %v2133_v50, %s3231_s10 }
0x2714   :  { %v2136_v51 = vpop.permute.xlu0 %2135 }
0x2715   :  { %v2138_v52 = vsel %vm391_vm3, %v2136_v51, 0.0 }
0x2716   :  { %2139 = vadd.xlane.f32.xlu0 %v2138_v52 }
0x27a3   :  { %v2140_v53 = vpop.xlane.xlu0 %2139 }
0x27a4   :  { %v2141_v54 = vrot.slane %v2140_v53, 4 }
0x27a6   :  { %v2142_v55 = vadd.f32 %v2141_v54, %v2140_v53 }
0x27a8   :  { %v2143_v45 = vrot.slane %v2142_v55, 2 }
0x27aa   :  { %v2144_v56 = vadd.f32 %v2143_v45, %v2142_v55 }
0x27ac   :  { %v2145_v62 = vrot.slane %v2144_v56, 1 }
0x27ae   :  { %v2146_v63 = vadd.f32 %v2145_v62, %v2144_v56 }
0x27b0   :  { %3041 = vpush %v2146_v63 }
0x27e1   :  { %s3042_s17 = spop %3041 }
0x27e2   :  { %s2148_s0 = sadd.f32 %s3042_s17, %s3820_s8 }
0x27e4   :  { %v2150_v1 = vstv %s2148_s0  ;;  %s3837_s16 = smov (!%p2153_p3, %s2497_s16), %s2148_s0 }
0x27e5   :  { %v3769_v2 = vsel %vm2149_vm10, %v2150_v1, %v3705_v11  ;;  %v2157_v57 = vstv %s3837_s16 }
0x27e6   :  { %v2158_v5 = vmul.f32 %v3713_v19, %v2157_v57 }
0x27e8   :  { %v2159_v9 = vadd.f32 %v2158_v5, %v2156_v61 }
0x27ea   :  { %v2230_v59 = vadd.f32 %v2226_v30, %v2159_v9 }
0x27ec   :  { %3113 = vtanh.f32 %v2230_v59 }
0x27f6   :  { %v3114_v60 = vpop.eup %3113 }
0x27f7   :  { %v2232_v58 = vmul.f32 0.5, %v3114_v60 }
0x27f9   :  { %v2233_v10 = vadd.f32 0.5, %v2232_v58 }
0x27fb   :  { %v2234_v12 = vsel %vm87_vm1, %v2233_v10, %v3114_v60 }
0x27fc   :  { %2237 = vrot.lane.b32.xlu1 %v2234_v12, %s3230_s30  ;;  %v2235_v20 = vmul.f32 %v2234_v12, %v3721_v18 }
0x286e   :  { %v2238_v11 = vpop.permute.xlu1 %2237 }
0x286f   :  { %v2240_v13 = vmul.f32 %v2238_v11, %v2234_v12 }
0x2871   :  { %2242 = vrot.lane.b32.xlu1 %v2240_v13, %s3230_s30 }
0x28e3   :  { %v2243_v21 = vpop.permute.xlu1 %2242 }
0x28e4   :  { %v2245_v22 = vadd.f32 %v2243_v21, %v2235_v20 }
0x28e6   :  { %3115 = vtanh.f32 %v2245_v22 }
0x28f0   :  { %v3116_v19 = vpop.eup %3115 }
0x28f1   :  { %2248 = vrot.lane.b32.xlu1 %v3116_v19, %s3230_s30 }
0x28f5   :  { %2253 = vrot.lane.b32.xlu1 %v2132_v49, %s3231_s10 }
0x2963   :  { %v2249_v23 = vpop.permute.xlu1 %2248 }
0x2964   :  { %v2251_v24 = vmul.f32 %v2249_v23, %v2234_v12 }
0x2966   :  { %2328 = vrot.lane.b32.xlu1 %v2251_v24, %s3231_s10 }
0x2967   :  { %v2254_v25 = vpop.permute.xlu1 %2253 }
0x2968   :  { %2872 = vmatmul.mubr.msk.f32.vlgmr.msra.gmra.mrb[22].mxu0 %vm115_vm2, %v2254_v25 }
0x29d8   :  { %v2329_v14 = vpop.permute.xlu1 %2328 }
0x29d9   :  { %2883 = vmatmul.mubr.msk.f32.vlgmr.msra.gmra.mrb[22].mxu1 %vm115_vm2, %v2329_v14 }
0x2a3b   :  { %v2323_v27 = vpop.f32.mrb[22].mxu0 }
0x2a3c   :  { %v2873_v28 = vpop.f32.mrb[23].mxu0 }
0x2aac   :  { %v2398_v15 = vpop.f32.mrb[22].mxu1 }
0x2aad   :  { %v2399_v16 = vadd.f32 %v2398_v15, %v2323_v27  ;;  %v2884_v18 = vpop.f32.mrb[23].mxu1 }
0x2aaf   :  { %v2402_v29 = vadd.f32 %v3749_v34, %v2399_v16 }
0x2ab1   :  { %3117 = vtanh.f32 %v2402_v29 }
0x2abb   :  { %v3118_v8 = vpop.eup %3117 }
0x2abc   :  { %v2404_v39 = vmul.f32 0.5, %v3118_v8 }
0x2abe   :  { %v2405_v40 = vadd.f32 0.5, %v2404_v39 }
0x2ac0   :  { %v2406_v31 = vsel %vm87_vm1, %v2405_v40, %v3118_v8 }
0x2ac1   :  { %2409 = vrot.lane.b32.xlu1 %v2406_v31, %s3230_s30  ;;  %v2407_v26 = vmul.f32 %v2406_v31, %v3757_v46 }
0x2b33   :  { %v2410_v4 = vpop.permute.xlu1 %2409 }
0x2b34   :  { %v2412_v7 = vmul.f32 %v2410_v4, %v2406_v31 }
0x2b36   :  { %2414 = vrot.lane.b32.xlu1 %v2412_v7, %s3230_s30 }
0x2ba8   :  { %v2415_v30 = vpop.permute.xlu1 %2414 }
0x2ba9   :  { %v2417_v32 = vadd.f32 %v2415_v30, %v2407_v26 }
0x2bab   :  { %3119 = vtanh.f32 %v2417_v32 }
0x2bb5   :  { %v3120_v41 = vpop.eup %3119 }
0x2bb6   :  { %2420 = vrot.lane.b32.xlu1 %v3120_v41, %s3230_s30  ;;  %s3232_s30 = smov [#allocation12]  }
0x2bb7   :  { %s2451_s22 = sshll.u32 %s3232_s30, 4  ;;  %s2452_s22 = int_to_ptr.vmem [resolvable:$true] %s2451_s22 }
0x2bb8   :  { %s3193_s5 = scalar_lea.vmem %s2452_s22, 32  ;;  %p3194_p5 = scmp.lt.s32.totalorder %s2452_s22, %s2452_s22 }
0x2c28   :  { %v2421_v35 = vpop.permute.xlu1 %2420 }
0x2c29   :  { %v2423_v34 = vmul.f32 %v2421_v35, %v2406_v31 }
0x2c2b   :  { %v2424_v3 = vmul.f32 %v2423_v34, %v3415_v0 }
0x2c2d   :  { %2426 = vrot.lane.b32.xlu0 %v2424_v3, %s3231_s10  ;;  %s3189_s10 = scalar_lea.vmem %s2452_s22, 16 }
0x2c2e   :  { %p3190_p4 = scmp.ne.s32.totalorder %s2452_s22, %s3189_s10  ;;  %p3195_p6 = scmp.lt.s32.totalorder %s3193_s5, %s3189_s10 }
0x2c30   :  { %p3196_p7 = por %p3195_p6, %p3194_p5 }
0x2c32   :  { %p3197_p8 = pnand %p3196_p7, %p3190_p4 }
0x2c9f   :  { %v2427_v6 = vpop.permute.xlu0 %2426 }
0x2ca0   :  { %v2429_v36 = vsel %vm391_vm3, %v2427_v6, 0.0 }
0x2ca1   :  { %2430 = vadd.xlane.f32.xlu1 %v2429_v36 }
0x2d2e   :  { %v2431_v37 = vpop.xlane.xlu1 %2430 }
0x2d2f   :  { %v2432_v38 = vrot.slane %v2431_v37, 4 }
0x2d31   :  { %v2433_v33 = vadd.f32 %v2432_v38, %v2431_v37 }
0x2d33   :  { %v2434_v42 = vrot.slane %v2433_v33, 2 }
0x2d35   :  { %v2435_v43 = vadd.f32 %v2434_v42, %v2433_v33 }
0x2d37   :  { %v2436_v44 = vrot.slane %v2435_v43, 1 }
0x2d39   :  { %v2437_v46 = vadd.f32 %v2436_v44, %v2435_v43 }
0x2d3b   :  { %3043 = vpush %v2437_v46 }
0x2d6c   :  { %s3044_s2 = spop %3043 }
0x2d6d   :  { %s2439_s24 = sadd.f32 %s3044_s2, %s3820_s8 }
0x2d6f   :  { %v2441_v0 = vstv %s2439_s24 }
0x2d70   :  { %v2442_v47 = vsel %vm2440_vm11, %v2441_v0, %v3769_v2 }
0x2d71   :  { %2444 = vst.msk [vmem:[#allocation12] sm:$0x1] %vm2443_vm12, %v2442_v47 }
0x2d72   :  { %3200 = shalt.err (!%p3197_p8)
}
0x2d73   :  { %s3201_s8 = scalar_lea.hbm %s3821_s9, 16 }
0x2d74   :  { %p3202_p9 = scmp.ne.s32.totalorder %s3821_s9, %s3201_s8  ;;  %p3205_p10 = scmp.lt.u32.totalorder %s3201_s8, %s3821_s9 }
0x2d76   :  { %p3207_p11 = pnand %p3205_p10, %p3202_p9 }
0x2d78   :  { %3210 = shalt.err (!%p3207_p11)
}
0x2d79   :  { %2454 = dma.vmem_to_hbm [thread:$0]  %s2452_s22, 16, %s3821_s9, [#allocation5]  }
0x2d7a   :  { %3219 = dma.done.wait [#allocation5], 16  }
0x2d7b   :  { %3220 = vsyncadd [#allocation5], 4294967280 }
0x2d7c   :  { %2458 = vsyncpa [#allocation4], 1 }
0x2d7d   :  { %2459 = vsyncpa [#allocation11], 1 }
0x2d7e   :  { %2460 = vsyncpa [#allocation5], 1 }
0x2d7f   :  { %2461 = vsyncpa [#allocation6], 1 }
0x2d80   :  { %2462 = vsyncpa [#allocation7], 1 }

</bundles_post_ra>
